<compile_context>
chip_gen: v7x
topology: tpu7x:2x2x1
jax: 0.10.0
libtpu: 0.0.40
codegen_flags: <defaults>
</compile_context>

<pallas_src>
import functools
import math

import jax
import jax.numpy as jnp
from jax.experimental import pallas as pl
from jax.experimental.pallas import tpu as pltpu

_VMEM = pl.BlockSpec(memory_space=pltpu.MemorySpace.VMEM)
_BN_EPS = 1e-5
_PARAMS_PER_BLOCK = 10  # w1, b1, w2, b2, g1, be1, w3, b3, g2, be2


# ------------------------------ fused kernel ------------------------------- #

def _make_encoder_block_kernel(cfg):
    """cfg: tuple of per-ConvBlock static dicts {L_in, L_out, c_in, c_mid, c_out}."""
    n_blocks = len(cfg)

    def _bn_swish(z, g_ref, be_ref):
        # Training-mode BatchNorm1d (batch statistics over (B, L)) fused with Swish.
        mean = jnp.mean(z, axis=(0, 1), keepdims=True)
        var = jnp.mean((z - mean) ** 2, axis=(0, 1), keepdims=True)   # biased var
        scale = g_ref[...][None] * jax.lax.rsqrt(var + _BN_EPS)       # (1,1,C)
        y = (z - mean) * scale + be_ref[...][None]
        return y * jax.nn.sigmoid(y)                                   # Swish

    def _conv_k3(x_val, pad_ref, w_ref, b_ref, stride, L_in, L_out):
        # x_val: (B, L_in, Cin);  pad_ref: (B, L_in + 2, Cin) VMEM scratch.
        B, _, Cin = x_val.shape
        zero_row = jnp.zeros((B, 1, Cin), jnp.float32)
        pad_ref[:, 0:1, :] = zero_row                   # left zero pad
        pad_ref[:, L_in + 1:L_in + 2, :] = zero_row     # right zero pad
        pad_ref[:, 1:L_in + 1, :] = x_val
        acc = None
        for k in range(3):                              # static unroll over taps
            if stride == 1:
                tap = pad_ref[:, k:k + L_out, :]
            else:
                tap = pad_ref[:, pl.ds(k, L_out, stride), :]   # strided gather
            part = jax.lax.dot_general(
                tap, w_ref[k],
                dimension_numbers=(((2,), (0,)), ((), ())),
                preferred_element_type=jnp.float32)
            acc = part if acc is None else acc + part
        return acc + b_ref[...][None]                   # (B, L_out, Cout)

    def kernel(*refs):
        x_ref = refs[0]
        param_refs = refs[1:1 + _PARAMS_PER_BLOCK * n_blocks]
        out_ref = refs[1 + _PARAMS_PER_BLOCK * n_blocks]
        scratch_refs = refs[2 + _PARAMS_PER_BLOCK * n_blocks:]

        h = x_ref[...]                                  # (B, L0, C0) channels-last
        for i, c in enumerate(cfg):
            (w1, b1, w2, b2, g1, be1, w3, b3, g2, be2) = \
                param_refs[_PARAMS_PER_BLOCK * i:_PARAMS_PER_BLOCK * (i + 1)]
            pad_a = scratch_refs[2 * i]
            pad_c = scratch_refs[2 * i + 1]
            # Conv1d(k3, p1, s1)
            a = _conv_k3(h, pad_a, w1, b1, 1, c["L_in"], c["L_in"])
            # Conv1d(k1) -> BN -> Swish  (1x1 conv == matmul over channels)
            m = jax.lax.dot_general(
                a, w2[...],
                dimension_numbers=(((2,), (0,)), ((), ())),
                preferred_element_type=jnp.float32) + b2[...][None]
            m = _bn_swish(m, g1, be1)
            # Conv1d(k3, p1, s2) -> BN -> Swish
            y = _conv_k3(m, pad_c, w3, b3, 2, c["L_in"], c["L_out"])
            h = _bn_swish(y, g2, be2)
        out_ref[...] = h

    return kernel


# ------------------------------ thin wrapper ------------------------------- #

def _block_cfg(channels, L):
    cfg = []
    L_cur = L
    for i in range(len(channels) - 1):
        c_out = channels[i + 1]
        L_out = (L_cur - 1) // 2 + 1     # PyTorch Conv1d(k3, s2, p1) output length
        cfg.append(dict(L_in=L_cur, L_out=L_out,
                        c_in=channels[i], c_mid=c_out // 2, c_out=c_out))
        L_cur = L_out
    return tuple(cfg)


def encoder_block_forward(params, x_ncl, *, channels):
    """x_ncl: (B, C_in, L) in PyTorch NCL layout.  Returns (B, C_out, L_out) NCL."""
    B, c_in, L = x_ncl.shape
    assert c_in == channels[0]
    cfg = _block_cfg(channels, L)

    x = jnp.transpose(x_ncl.astype(jnp.float32), (0, 2, 1))       # -> (B, L, C_in)

    flat_params = []
    scratch = []
    for i, c in enumerate(cfg):
        p = params["blocks"][i]
        flat_params += [p["w1"], p["b1"], p["w2"], p["b2"], p["g1"], p["be1"],
                        p["w3"], p["b3"], p["g2"], p["be2"]]
        scratch.append(pltpu.VMEM((B, c["L_in"] + 2, c["c_in"]), jnp.float32))
        scratch.append(pltpu.VMEM((B, c["L_in"] + 2, c["c_mid"]), jnp.float32))

    out = pl.pallas_call(
        _make_encoder_block_kernel(cfg),
        out_shape=jax.ShapeDtypeStruct((B, cfg[-1]["L_out"], cfg[-1]["c_out"]),
                                       jnp.float32),
        in_specs=[_VMEM] * (1 + len(flat_params)),
        out_specs=_VMEM,
        scratch_shapes=scratch,
    )(x, *flat_params)

    return jnp.transpose(out, (0, 2, 1))                           # back to NCL


# ------------------------- parameter initialization ------------------------ #

def _init_conv(key, cin, cout, k):
    kw, kb = jax.random.split(key)
    bound = 1.0 / math.sqrt(cin * k)
    w = jax.random.uniform(kw, (k, cin, cout), jnp.float32, -bound, bound)
    b = jax.random.uniform(kb, (1, cout), jnp.float32, -bound, bound)
    return w, b


def _init_bn(c):
    return jnp.ones((1, c), jnp.float32), jnp.zeros((1, c), jnp.float32)


def init_encoder_block_params(key, channels):
    blocks = []
    for i in range(len(channels) - 1):
        c_in, c_out = channels[i], channels[i + 1]
        c_mid = c_out // 2
        key, k1, k2, k3 = jax.random.split(key, 4)
        p = {}
        p["w1"], p["b1"] = _init_conv(k1, c_in, c_out, 3)
        w2, p["b2"] = _init_conv(k2, c_out, c_mid, 1)
        p["w2"] = w2[0]                                   # (c_out, c_mid)
        p["g1"], p["be1"] = _init_bn(c_mid)
        p["w3"], p["b3"] = _init_conv(k3, c_mid, c_out, 3)
        p["g2"], p["be2"] = _init_bn(c_out)
        blocks.append(p)
    return {"blocks": blocks}


# ------------------------- pure-JAX reference check ------------------------ #

def _ref_conv1d(x, w, b, stride, padding):
    B, L, _ = x.shape
    K, _, Cout = w.shape
    xp = jnp.pad(x, ((0, 0), (padding, padding), (0, 0)))
    Lo = (xp.shape[1] - K) // stride + 1
    y = jnp.zeros((B, Lo, Cout), jnp.float32)
    for k in range(K):
        tap = xp[:, k:k + stride * Lo:stride, :]
        y = y + jnp.einsum("blc,cd->bld", tap, w[k],
                           precision=jax.lax.Precision.HIGHEST)
    return y + b[None]


def _ref_bn_swish(x, g, b):
    mean = x.mean(axis=(0, 1), keepdims=True)
    var = ((x - mean) ** 2).mean(axis=(0, 1), keepdims=True)
    y = (x - mean) * (g[None] * jax.lax.rsqrt(var + _BN_EPS)) + b[None]
    return y * jax.nn.sigmoid(y)


def encoder_block_reference(params, x_ncl, *, channels):
    x = jnp.transpose(x_ncl.astype(jnp.float32), (0, 2, 1))
    for p in params["blocks"]:
        a = _ref_conv1d(x, p["w1"], p["b1"], 1, 1)
        m = jnp.einsum("blc,cd->bld", a, p["w2"],
                       precision=jax.lax.Precision.HIGHEST) + p["b2"][None]
        m = _ref_bn_swish(m, p["g1"], p["be1"])
        y = _ref_conv1d(m, p["w3"], p["b3"], 2, 1)
        x = _ref_bn_swish(y, p["g2"], p["be2"])
    return jnp.transpose(x, (0, 2, 1))


# ----------------------------------- main ----------------------------------- #

if __name__ == "__main__":
    B, L = 2, 64
    channels = (4, 16, 32)                      # EncoderBlock([4, 16, 32])

    key = jax.random.PRNGKey(0)
    k_param, k_data = jax.random.split(key)
    params = init_encoder_block_params(k_param, channels)
    x = jax.random.normal(k_data, (B, channels[0], L), jnp.float32)   # NCL input

    fwd = jax.jit(functools.partial(encoder_block_forward, channels=channels))
    y = fwd(params, x)
    jax.block_until_ready(y)

    assert y.shape == (B, channels[-1], L // 4), y.shape

    y_ref = encoder_block_reference(params, x, channels=channels)
    err = float(jnp.max(jnp.abs(y - y_ref)))
    assert err < 2e-3, f"max abs error vs reference: {err}"

    print("KERNEL_OK")
</pallas_src>

<mosaic_0001>
module attributes {stable_mosaic.version = 11 : i64} {
  func.func @kernel(%arg0: memref<2x64x4xf32, #tpu.memory_space<vmem>>, %arg1: memref<3x4x16xf32, #tpu.memory_space<vmem>>, %arg2: memref<1x16xf32, #tpu.memory_space<vmem>>, %arg3: memref<16x8xf32, #tpu.memory_space<vmem>>, %arg4: memref<1x8xf32, #tpu.memory_space<vmem>>, %arg5: memref<1x8xf32, #tpu.memory_space<vmem>>, %arg6: memref<1x8xf32, #tpu.memory_space<vmem>>, %arg7: memref<3x8x16xf32, #tpu.memory_space<vmem>>, %arg8: memref<1x16xf32, #tpu.memory_space<vmem>>, %arg9: memref<1x16xf32, #tpu.memory_space<vmem>>, %arg10: memref<1x16xf32, #tpu.memory_space<vmem>>, %arg11: memref<3x16x32xf32, #tpu.memory_space<vmem>>, %arg12: memref<1x32xf32, #tpu.memory_space<vmem>>, %arg13: memref<32x16xf32, #tpu.memory_space<vmem>>, %arg14: memref<1x16xf32, #tpu.memory_space<vmem>>, %arg15: memref<1x16xf32, #tpu.memory_space<vmem>>, %arg16: memref<1x16xf32, #tpu.memory_space<vmem>>, %arg17: memref<3x16x32xf32, #tpu.memory_space<vmem>>, %arg18: memref<1x32xf32, #tpu.memory_space<vmem>>, %arg19: memref<1x32xf32, #tpu.memory_space<vmem>>, %arg20: memref<1x32xf32, #tpu.memory_space<vmem>>, %arg21: memref<2x16x32xf32, #tpu.memory_space<vmem>>, %arg22: memref<2x66x4xf32, #tpu.memory_space<vmem>>, %arg23: memref<2x66x8xf32, #tpu.memory_space<vmem>>, %arg24: memref<2x34x16xf32, #tpu.memory_space<vmem>>, %arg25: memref<2x34x16xf32, #tpu.memory_space<vmem>>) attributes {dimension_semantics = [], scalar_prefetch = 0 : i64, scratch_operands = 4 : i64, tpu.core_type = #tpu.core_type<tc>} {
    %c0 = arith.constant 0 : index
    %c0_0 = arith.constant 0 : index
    %c0_1 = arith.constant 0 : index
    %0 = vector.load %arg0[%c0, %c0_0, %c0_1] : memref<2x64x4xf32, #tpu.memory_space<vmem>>, vector<2x64x4xf32>
    %cst = arith.constant 0.000000e+00 : f32
    %1 = vector.broadcast %cst : f32 to vector<2x1x4xf32>
    %c0_2 = arith.constant 0 : index
    %c0_3 = arith.constant 0 : index
    %c0_4 = arith.constant 0 : index
    %2 = vector.load %arg22[%c0_2, %c0_3, %c0_4] : memref<2x66x4xf32, #tpu.memory_space<vmem>>, vector<2x1x4xf32>
    tpu.vector_store %arg22[%c0_2, %c0_3, %c0_4], %1 {strides = array<i32>} : memref<2x66x4xf32, #tpu.memory_space<vmem>>, vector<2x1x4xf32>,
    %c0_5 = arith.constant 0 : index
    %c65 = arith.constant 65 : index
    %c0_6 = arith.constant 0 : index
    %3 = vector.load %arg22[%c0_5, %c65, %c0_6] : memref<2x66x4xf32, #tpu.memory_space<vmem>>, vector<2x1x4xf32>
    tpu.vector_store %arg22[%c0_5, %c65, %c0_6], %1 {strides = array<i32>} : memref<2x66x4xf32, #tpu.memory_space<vmem>>, vector<2x1x4xf32>,
    %c0_7 = arith.constant 0 : index
    %c1 = arith.constant 1 : index
    %c0_8 = arith.constant 0 : index
    %4 = vector.load %arg22[%c0_7, %c1, %c0_8] : memref<2x66x4xf32, #tpu.memory_space<vmem>>, vector<2x64x4xf32>
    tpu.vector_store %arg22[%c0_7, %c1, %c0_8], %0 {strides = array<i32>} : memref<2x66x4xf32, #tpu.memory_space<vmem>>, vector<2x64x4xf32>,
    %c0_9 = arith.constant 0 : index
    %c0_10 = arith.constant 0 : index
    %c0_11 = arith.constant 0 : index
    %5 = vector.load %arg22[%c0_9, %c0_10, %c0_11] : memref<2x66x4xf32, #tpu.memory_space<vmem>>, vector<2x64x4xf32>
    %c0_12 = arith.constant 0 : index
    %c0_13 = arith.constant 0 : index
    %c0_14 = arith.constant 0 : index
    %6 = vector.load %arg1[%c0_12, %c0_13, %c0_14] : memref<3x4x16xf32, #tpu.memory_space<vmem>>, vector<1x4x16xf32>
    %7 = vector.shape_cast %6 : vector<1x4x16xf32> to vector<4x16xf32>
    %cst_15 = arith.constant dense<0.000000e+00> : vector<2x64x16xf32>
    %8 = tpu.matmul %5, %7, %cst_15 {dimension_numbers = #tpu.dot_dimension_numbers<[2], [0], [0, 1], [1], [0, 0, 0, 1, 1, 1], [], []>} : vector<2x64x4xf32>, vector<4x16xf32>, vector<2x64x16xf32> -> vector<2x64x16xf32>
    %c0_16 = arith.constant 0 : index
    %c1_17 = arith.constant 1 : index
    %c0_18 = arith.constant 0 : index
    %9 = vector.load %arg22[%c0_16, %c1_17, %c0_18] : memref<2x66x4xf32, #tpu.memory_space<vmem>>, vector<2x64x4xf32>
    %c1_19 = arith.constant 1 : index
    %c0_20 = arith.constant 0 : index
    %c0_21 = arith.constant 0 : index
    %10 = vector.load %arg1[%c1_19, %c0_20, %c0_21] : memref<3x4x16xf32, #tpu.memory_space<vmem>>, vector<1x4x16xf32>
    %11 = vector.shape_cast %10 : vector<1x4x16xf32> to vector<4x16xf32>
    %cst_22 = arith.constant dense<0.000000e+00> : vector<2x64x16xf32>
    %12 = tpu.matmul %9, %11, %cst_22 {dimension_numbers = #tpu.dot_dimension_numbers<[2], [0], [0, 1], [1], [0, 0, 0, 1, 1, 1], [], []>} : vector<2x64x4xf32>, vector<4x16xf32>, vector<2x64x16xf32> -> vector<2x64x16xf32>
    %13 = arith.addf %8, %12 : vector<2x64x16xf32>
    %c0_23 = arith.constant 0 : index
    %c2 = arith.constant 2 : index
    %c0_24 = arith.constant 0 : index
    %14 = vector.load %arg22[%c0_23, %c2, %c0_24] : memref<2x66x4xf32, #tpu.memory_space<vmem>>, vector<2x64x4xf32>
    %c2_25 = arith.constant 2 : index
    %c0_26 = arith.constant 0 : index
    %c0_27 = arith.constant 0 : index
    %15 = vector.load %arg1[%c2_25, %c0_26, %c0_27] : memref<3x4x16xf32, #tpu.memory_space<vmem>>, vector<1x4x16xf32>
    %16 = vector.shape_cast %15 : vector<1x4x16xf32> to vector<4x16xf32>
    %cst_28 = arith.constant dense<0.000000e+00> : vector<2x64x16xf32>
    %17 = tpu.matmul %14, %16, %cst_28 {dimension_numbers = #tpu.dot_dimension_numbers<[2], [0], [0, 1], [1], [0, 0, 0, 1, 1, 1], [], []>} : vector<2x64x4xf32>, vector<4x16xf32>, vector<2x64x16xf32> -> vector<2x64x16xf32>
    %18 = arith.addf %13, %17 : vector<2x64x16xf32>
    %c0_29 = arith.constant 0 : index
    %c0_30 = arith.constant 0 : index
    %19 = vector.load %arg2[%c0_29, %c0_30] : memref<1x16xf32, #tpu.memory_space<vmem>>, vector<1x16xf32>
    %20 = vector.shape_cast %19 : vector<1x16xf32> to vector<1x1x16xf32>
    %21 = vector.broadcast %20 : vector<1x1x16xf32> to vector<2x64x16xf32>
    %22 = arith.addf %18, %21 : vector<2x64x16xf32>
    %c0_31 = arith.constant 0 : index
    %c0_32 = arith.constant 0 : index
    %23 = vector.load %arg3[%c0_31, %c0_32] : memref<16x8xf32, #tpu.memory_space<vmem>>, vector<16x8xf32>
    %cst_33 = arith.constant dense<0.000000e+00> : vector<2x64x8xf32>
    %24 = tpu.matmul %22, %23, %cst_33 {dimension_numbers = #tpu.dot_dimension_numbers<[2], [0], [0, 1], [1], [0, 0, 0, 1, 1, 1], [], []>} : vector<2x64x16xf32>, vector<16x8xf32>, vector<2x64x8xf32> -> vector<2x64x8xf32>
    %c0_34 = arith.constant 0 : index
    %c0_35 = arith.constant 0 : index
    %25 = vector.load %arg4[%c0_34, %c0_35] : memref<1x8xf32, #tpu.memory_space<vmem>>, vector<1x8xf32>
    %26 = vector.shape_cast %25 : vector<1x8xf32> to vector<1x1x8xf32>
    %27 = vector.broadcast %26 : vector<1x1x8xf32> to vector<2x64x8xf32>
    %28 = arith.addf %24, %27 : vector<2x64x8xf32>
    %cst_36 = arith.constant dense<0.000000e+00> : vector<8xf32>
    %29 = vector.multi_reduction <add>, %28, %cst_36 [0, 1] : vector<2x64x8xf32> to vector<8xf32>
    %30 = vector.shape_cast %29 : vector<8xf32> to vector<1x1x8xf32>
    %cst_37 = arith.constant 1.280000e+02 : f32
    %31 = vector.broadcast %cst_37 : f32 to vector<1x1x8xf32>
    %32 = arith.divf %30, %31 : vector<1x1x8xf32>
    %33 = vector.broadcast %32 : vector<1x1x8xf32> to vector<2x64x8xf32>
    %34 = arith.subf %28, %33 : vector<2x64x8xf32>
    %35 = arith.mulf %34, %34 : vector<2x64x8xf32>
    %cst_38 = arith.constant dense<0.000000e+00> : vector<8xf32>
    %36 = vector.multi_reduction <add>, %35, %cst_38 [0, 1] : vector<2x64x8xf32> to vector<8xf32>
    %37 = vector.shape_cast %36 : vector<8xf32> to vector<1x1x8xf32>
    %cst_39 = arith.constant 1.280000e+02 : f32
    %38 = vector.broadcast %cst_39 : f32 to vector<1x1x8xf32>
    %39 = arith.divf %37, %38 : vector<1x1x8xf32>
    %c0_40 = arith.constant 0 : index
    %c0_41 = arith.constant 0 : index
    %40 = vector.load %arg5[%c0_40, %c0_41] : memref<1x8xf32, #tpu.memory_space<vmem>>, vector<1x8xf32>
    %41 = vector.shape_cast %40 : vector<1x8xf32> to vector<1x1x8xf32>
    %cst_42 = arith.constant 9.99999974E-6 : f32
    %42 = vector.broadcast %cst_42 : f32 to vector<1x1x8xf32>
    %43 = arith.addf %39, %42 : vector<1x1x8xf32>
    %44 = math.rsqrt %43 : vector<1x1x8xf32>
    %45 = arith.mulf %41, %44 : vector<1x1x8xf32>
    %46 = vector.broadcast %32 : vector<1x1x8xf32> to vector<2x64x8xf32>
    %47 = arith.subf %28, %46 : vector<2x64x8xf32>
    %48 = vector.broadcast %45 : vector<1x1x8xf32> to vector<2x64x8xf32>
    %49 = arith.mulf %47, %48 : vector<2x64x8xf32>
    %c0_43 = arith.constant 0 : index
    %c0_44 = arith.constant 0 : index
    %50 = vector.load %arg6[%c0_43, %c0_44] : memref<1x8xf32, #tpu.memory_space<vmem>>, vector<1x8xf32>
    %51 = vector.shape_cast %50 : vector<1x8xf32> to vector<1x1x8xf32>
    %52 = vector.broadcast %51 : vector<1x1x8xf32> to vector<2x64x8xf32>
    %53 = arith.addf %49, %52 : vector<2x64x8xf32>
    %54 = arith.negf %53 : vector<2x64x8xf32>
    %55 = math.exp %54 : vector<2x64x8xf32>
    %cst_45 = arith.constant 1.000000e+00 : f32
    %56 = vector.broadcast %cst_45 : f32 to vector<2x64x8xf32>
    %57 = arith.addf %56, %55 : vector<2x64x8xf32>
    %58 = arith.divf %56, %57 : vector<2x64x8xf32>
    %59 = arith.mulf %53, %58 : vector<2x64x8xf32>
    %cst_46 = arith.constant 0.000000e+00 : f32
    %60 = vector.broadcast %cst_46 : f32 to vector<2x1x8xf32>
    %c0_47 = arith.constant 0 : index
    %c0_48 = arith.constant 0 : index
    %c0_49 = arith.constant 0 : index
    %61 = vector.load %arg23[%c0_47, %c0_48, %c0_49] : memref<2x66x8xf32, #tpu.memory_space<vmem>>, vector<2x1x8xf32>
    tpu.vector_store %arg23[%c0_47, %c0_48, %c0_49], %60 {strides = array<i32>} : memref<2x66x8xf32, #tpu.memory_space<vmem>>, vector<2x1x8xf32>,
    %c0_50 = arith.constant 0 : index
    %c65_51 = arith.constant 65 : index
    %c0_52 = arith.constant 0 : index
    %62 = vector.load %arg23[%c0_50, %c65_51, %c0_52] : memref<2x66x8xf32, #tpu.memory_space<vmem>>, vector<2x1x8xf32>
    tpu.vector_store %arg23[%c0_50, %c65_51, %c0_52], %60 {strides = array<i32>} : memref<2x66x8xf32, #tpu.memory_space<vmem>>, vector<2x1x8xf32>,
    %c0_53 = arith.constant 0 : index
    %c1_54 = arith.constant 1 : index
    %c0_55 = arith.constant 0 : index
    %63 = vector.load %arg23[%c0_53, %c1_54, %c0_55] : memref<2x66x8xf32, #tpu.memory_space<vmem>>, vector<2x64x8xf32>
    tpu.vector_store %arg23[%c0_53, %c1_54, %c0_55], %59 {strides = array<i32>} : memref<2x66x8xf32, #tpu.memory_space<vmem>>, vector<2x64x8xf32>,
    %c0_56 = arith.constant 0 : index
    %c0_57 = arith.constant 0 : index
    %c0_58 = arith.constant 0 : index
    %64 = tpu.strided_load %arg23[%c0_56, %c0_57, %c0_58] {strides = array<i32: 1, 2, 1>} : memref<2x66x8xf32, #tpu.memory_space<vmem>>, vector<2x32x8xf32>
    %c0_59 = arith.constant 0 : index
    %c0_60 = arith.constant 0 : index
    %c0_61 = arith.constant 0 : index
    %65 = vector.load %arg7[%c0_59, %c0_60, %c0_61] : memref<3x8x16xf32, #tpu.memory_space<vmem>>, vector<1x8x16xf32>
    %66 = vector.shape_cast %65 : vector<1x8x16xf32> to vector<8x16xf32>
    %cst_62 = arith.constant dense<0.000000e+00> : vector<2x32x16xf32>
    %67 = tpu.matmul %64, %66, %cst_62 {dimension_numbers = #tpu.dot_dimension_numbers<[2], [0], [0, 1], [1], [0, 0, 0, 1, 1, 1], [], []>} : vector<2x32x8xf32>, vector<8x16xf32>, vector<2x32x16xf32> -> vector<2x32x16xf32>
    %c0_63 = arith.constant 0 : index
    %c1_64 = arith.constant 1 : index
    %c0_65 = arith.constant 0 : index
    %68 = tpu.strided_load %arg23[%c0_63, %c1_64, %c0_65] {strides = array<i32: 1, 2, 1>} : memref<2x66x8xf32, #tpu.memory_space<vmem>>, vector<2x32x8xf32>
    %c1_66 = arith.constant 1 : index
    %c0_67 = arith.constant 0 : index
    %c0_68 = arith.constant 0 : index
    %69 = vector.load %arg7[%c1_66, %c0_67, %c0_68] : memref<3x8x16xf32, #tpu.memory_space<vmem>>, vector<1x8x16xf32>
    %70 = vector.shape_cast %69 : vector<1x8x16xf32> to vector<8x16xf32>
    %cst_69 = arith.constant dense<0.000000e+00> : vector<2x32x16xf32>
    %71 = tpu.matmul %68, %70, %cst_69 {dimension_numbers = #tpu.dot_dimension_numbers<[2], [0], [0, 1], [1], [0, 0, 0, 1, 1, 1], [], []>} : vector<2x32x8xf32>, vector<8x16xf32>, vector<2x32x16xf32> -> vector<2x32x16xf32>
    %72 = arith.addf %67, %71 : vector<2x32x16xf32>
    %c0_70 = arith.constant 0 : index
    %c2_71 = arith.constant 2 : index
    %c0_72 = arith.constant 0 : index
    %73 = tpu.strided_load %arg23[%c0_70, %c2_71, %c0_72] {strides = array<i32: 1, 2, 1>} : memref<2x66x8xf32, #tpu.memory_space<vmem>>, vector<2x32x8xf32>
    %c2_73 = arith.constant 2 : index
    %c0_74 = arith.constant 0 : index
    %c0_75 = arith.constant 0 : index
    %74 = vector.load %arg7[%c2_73, %c0_74, %c0_75] : memref<3x8x16xf32, #tpu.memory_space<vmem>>, vector<1x8x16xf32>
    %75 = vector.shape_cast %74 : vector<1x8x16xf32> to vector<8x16xf32>
    %cst_76 = arith.constant dense<0.000000e+00> : vector<2x32x16xf32>
    %76 = tpu.matmul %73, %75, %cst_76 {dimension_numbers = #tpu.dot_dimension_numbers<[2], [0], [0, 1], [1], [0, 0, 0, 1, 1, 1], [], []>} : vector<2x32x8xf32>, vector<8x16xf32>, vector<2x32x16xf32> -> vector<2x32x16xf32>
    %77 = arith.addf %72, %76 : vector<2x32x16xf32>
    %c0_77 = arith.constant 0 : index
    %c0_78 = arith.constant 0 : index
    %78 = vector.load %arg8[%c0_77, %c0_78] : memref<1x16xf32, #tpu.memory_space<vmem>>, vector<1x16xf32>
    %79 = vector.shape_cast %78 : vector<1x16xf32> to vector<1x1x16xf32>
    %80 = vector.broadcast %79 : vector<1x1x16xf32> to vector<2x32x16xf32>
    %81 = arith.addf %77, %80 : vector<2x32x16xf32>
    %cst_79 = arith.constant dense<0.000000e+00> : vector<16xf32>
    %82 = vector.multi_reduction <add>, %81, %cst_79 [0, 1] : vector<2x32x16xf32> to vector<16xf32>
    %83 = vector.shape_cast %82 : vector<16xf32> to vector<1x1x16xf32>
    %cst_80 = arith.constant 6.400000e+01 : f32
    %84 = vector.broadcast %cst_80 : f32 to vector<1x1x16xf32>
    %85 = arith.divf %83, %84 : vector<1x1x16xf32>
    %86 = vector.broadcast %85 : vector<1x1x16xf32> to vector<2x32x16xf32>
    %87 = arith.subf %81, %86 : vector<2x32x16xf32>
    %88 = arith.mulf %87, %87 : vector<2x32x16xf32>
    %cst_81 = arith.constant dense<0.000000e+00> : vector<16xf32>
    %89 = vector.multi_reduction <add>, %88, %cst_81 [0, 1] : vector<2x32x16xf32> to vector<16xf32>
    %90 = vector.shape_cast %89 : vector<16xf32> to vector<1x1x16xf32>
    %cst_82 = arith.constant 6.400000e+01 : f32
    %91 = vector.broadcast %cst_82 : f32 to vector<1x1x16xf32>
    %92 = arith.divf %90, %91 : vector<1x1x16xf32>
    %c0_83 = arith.constant 0 : index
    %c0_84 = arith.constant 0 : index
    %93 = vector.load %arg9[%c0_83, %c0_84] : memref<1x16xf32, #tpu.memory_space<vmem>>, vector<1x16xf32>
    %94 = vector.shape_cast %93 : vector<1x16xf32> to vector<1x1x16xf32>
    %cst_85 = arith.constant 9.99999974E-6 : f32
    %95 = vector.broadcast %cst_85 : f32 to vector<1x1x16xf32>
    %96 = arith.addf %92, %95 : vector<1x1x16xf32>
    %97 = math.rsqrt %96 : vector<1x1x16xf32>
    %98 = arith.mulf %94, %97 : vector<1x1x16xf32>
    %99 = vector.broadcast %85 : vector<1x1x16xf32> to vector<2x32x16xf32>
    %100 = arith.subf %81, %99 : vector<2x32x16xf32>
    %101 = vector.broadcast %98 : vector<1x1x16xf32> to vector<2x32x16xf32>
    %102 = arith.mulf %100, %101 : vector<2x32x16xf32>
    %c0_86 = arith.constant 0 : index
    %c0_87 = arith.constant 0 : index
    %103 = vector.load %arg10[%c0_86, %c0_87] : memref<1x16xf32, #tpu.memory_space<vmem>>, vector<1x16xf32>
    %104 = vector.shape_cast %103 : vector<1x16xf32> to vector<1x1x16xf32>
    %105 = vector.broadcast %104 : vector<1x1x16xf32> to vector<2x32x16xf32>
    %106 = arith.addf %102, %105 : vector<2x32x16xf32>
    %107 = arith.negf %106 : vector<2x32x16xf32>
    %108 = math.exp %107 : vector<2x32x16xf32>
    %cst_88 = arith.constant 1.000000e+00 : f32
    %109 = vector.broadcast %cst_88 : f32 to vector<2x32x16xf32>
    %110 = arith.addf %109, %108 : vector<2x32x16xf32>
    %111 = arith.divf %109, %110 : vector<2x32x16xf32>
    %112 = arith.mulf %106, %111 : vector<2x32x16xf32>
    %cst_89 = arith.constant 0.000000e+00 : f32
    %113 = vector.broadcast %cst_89 : f32 to vector<2x1x16xf32>
    %c0_90 = arith.constant 0 : index
    %c0_91 = arith.constant 0 : index
    %c0_92 = arith.constant 0 : index
    %114 = vector.load %arg24[%c0_90, %c0_91, %c0_92] : memref<2x34x16xf32, #tpu.memory_space<vmem>>, vector<2x1x16xf32>
    tpu.vector_store %arg24[%c0_90, %c0_91, %c0_92], %113 {strides = array<i32>} : memref<2x34x16xf32, #tpu.memory_space<vmem>>, vector<2x1x16xf32>,
    %c0_93 = arith.constant 0 : index
    %c33 = arith.constant 33 : index
    %c0_94 = arith.constant 0 : index
    %115 = vector.load %arg24[%c0_93, %c33, %c0_94] : memref<2x34x16xf32, #tpu.memory_space<vmem>>, vector<2x1x16xf32>
    tpu.vector_store %arg24[%c0_93, %c33, %c0_94], %113 {strides = array<i32>} : memref<2x34x16xf32, #tpu.memory_space<vmem>>, vector<2x1x16xf32>,
    %c0_95 = arith.constant 0 : index
    %c1_96 = arith.constant 1 : index
    %c0_97 = arith.constant 0 : index
    %116 = vector.load %arg24[%c0_95, %c1_96, %c0_97] : memref<2x34x16xf32, #tpu.memory_space<vmem>>, vector<2x32x16xf32>
    tpu.vector_store %arg24[%c0_95, %c1_96, %c0_97], %112 {strides = array<i32>} : memref<2x34x16xf32, #tpu.memory_space<vmem>>, vector<2x32x16xf32>,
    %c0_98 = arith.constant 0 : index
    %c0_99 = arith.constant 0 : index
    %c0_100 = arith.constant 0 : index
    %117 = vector.load %arg24[%c0_98, %c0_99, %c0_100] : memref<2x34x16xf32, #tpu.memory_space<vmem>>, vector<2x32x16xf32>
    %c0_101 = arith.constant 0 : index
    %c0_102 = arith.constant 0 : index
    %c0_103 = arith.constant 0 : index
    %118 = vector.load %arg11[%c0_101, %c0_102, %c0_103] : memref<3x16x32xf32, #tpu.memory_space<vmem>>, vector<1x16x32xf32>
    %119 = vector.shape_cast %118 : vector<1x16x32xf32> to vector<16x32xf32>
    %cst_104 = arith.constant dense<0.000000e+00> : vector<2x32x32xf32>
    %120 = tpu.matmul %117, %119, %cst_104 {dimension_numbers = #tpu.dot_dimension_numbers<[2], [0], [0, 1], [1], [0, 0, 0, 1, 1, 1], [], []>} : vector<2x32x16xf32>, vector<16x32xf32>, vector<2x32x32xf32> -> vector<2x32x32xf32>
    %c0_105 = arith.constant 0 : index
    %c1_106 = arith.constant 1 : index
    %c0_107 = arith.constant 0 : index
    %121 = vector.load %arg24[%c0_105, %c1_106, %c0_107] : memref<2x34x16xf32, #tpu.memory_space<vmem>>, vector<2x32x16xf32>
    %c1_108 = arith.constant 1 : index
    %c0_109 = arith.constant 0 : index
    %c0_110 = arith.constant 0 : index
    %122 = vector.load %arg11[%c1_108, %c0_109, %c0_110] : memref<3x16x32xf32, #tpu.memory_space<vmem>>, vector<1x16x32xf32>
    %123 = vector.shape_cast %122 : vector<1x16x32xf32> to vector<16x32xf32>
    %cst_111 = arith.constant dense<0.000000e+00> : vector<2x32x32xf32>
    %124 = tpu.matmul %121, %123, %cst_111 {dimension_numbers = #tpu.dot_dimension_numbers<[2], [0], [0, 1], [1], [0, 0, 0, 1, 1, 1], [], []>} : vector<2x32x16xf32>, vector<16x32xf32>, vector<2x32x32xf32> -> vector<2x32x32xf32>
    %125 = arith.addf %120, %124 : vector<2x32x32xf32>
    %c0_112 = arith.constant 0 : index
    %c2_113 = arith.constant 2 : index
    %c0_114 = arith.constant 0 : index
    %126 = vector.load %arg24[%c0_112, %c2_113, %c0_114] : memref<2x34x16xf32, #tpu.memory_space<vmem>>, vector<2x32x16xf32>
    %c2_115 = arith.constant 2 : index
    %c0_116 = arith.constant 0 : index
    %c0_117 = arith.constant 0 : index
    %127 = vector.load %arg11[%c2_115, %c0_116, %c0_117] : memref<3x16x32xf32, #tpu.memory_space<vmem>>, vector<1x16x32xf32>
    %128 = vector.shape_cast %127 : vector<1x16x32xf32> to vector<16x32xf32>
    %cst_118 = arith.constant dense<0.000000e+00> : vector<2x32x32xf32>
    %129 = tpu.matmul %126, %128, %cst_118 {dimension_numbers = #tpu.dot_dimension_numbers<[2], [0], [0, 1], [1], [0, 0, 0, 1, 1, 1], [], []>} : vector<2x32x16xf32>, vector<16x32xf32>, vector<2x32x32xf32> -> vector<2x32x32xf32>
    %130 = arith.addf %125, %129 : vector<2x32x32xf32>
    %c0_119 = arith.constant 0 : index
    %c0_120 = arith.constant 0 : index
    %131 = vector.load %arg12[%c0_119, %c0_120] : memref<1x32xf32, #tpu.memory_space<vmem>>, vector<1x32xf32>
    %132 = vector.shape_cast %131 : vector<1x32xf32> to vector<1x1x32xf32>
    %133 = vector.broadcast %132 : vector<1x1x32xf32> to vector<2x32x32xf32>
    %134 = arith.addf %130, %133 : vector<2x32x32xf32>
    %c0_121 = arith.constant 0 : index
    %c0_122 = arith.constant 0 : index
    %135 = vector.load %arg13[%c0_121, %c0_122] : memref<32x16xf32, #tpu.memory_space<vmem>>, vector<32x16xf32>
    %cst_123 = arith.constant dense<0.000000e+00> : vector<2x32x16xf32>
    %136 = tpu.matmul %134, %135, %cst_123 {dimension_numbers = #tpu.dot_dimension_numbers<[2], [0], [0, 1], [1], [0, 0, 0, 1, 1, 1], [], []>} : vector<2x32x32xf32>, vector<32x16xf32>, vector<2x32x16xf32> -> vector<2x32x16xf32>
    %c0_124 = arith.constant 0 : index
    %c0_125 = arith.constant 0 : index
    %137 = vector.load %arg14[%c0_124, %c0_125] : memref<1x16xf32, #tpu.memory_space<vmem>>, vector<1x16xf32>
    %138 = vector.shape_cast %137 : vector<1x16xf32> to vector<1x1x16xf32>
    %139 = vector.broadcast %138 : vector<1x1x16xf32> to vector<2x32x16xf32>
    %140 = arith.addf %136, %139 : vector<2x32x16xf32>
    %cst_126 = arith.constant dense<0.000000e+00> : vector<16xf32>
    %141 = vector.multi_reduction <add>, %140, %cst_126 [0, 1] : vector<2x32x16xf32> to vector<16xf32>
    %142 = vector.shape_cast %141 : vector<16xf32> to vector<1x1x16xf32>
    %cst_127 = arith.constant 6.400000e+01 : f32
    %143 = vector.broadcast %cst_127 : f32 to vector<1x1x16xf32>
    %144 = arith.divf %142, %143 : vector<1x1x16xf32>
    %145 = vector.broadcast %144 : vector<1x1x16xf32> to vector<2x32x16xf32>
    %146 = arith.subf %140, %145 : vector<2x32x16xf32>
    %147 = arith.mulf %146, %146 : vector<2x32x16xf32>
    %cst_128 = arith.constant dense<0.000000e+00> : vector<16xf32>
    %148 = vector.multi_reduction <add>, %147, %cst_128 [0, 1] : vector<2x32x16xf32> to vector<16xf32>
    %149 = vector.shape_cast %148 : vector<16xf32> to vector<1x1x16xf32>
    %cst_129 = arith.constant 6.400000e+01 : f32
    %150 = vector.broadcast %cst_129 : f32 to vector<1x1x16xf32>
    %151 = arith.divf %149, %150 : vector<1x1x16xf32>
    %c0_130 = arith.constant 0 : index
    %c0_131 = arith.constant 0 : index
    %152 = vector.load %arg15[%c0_130, %c0_131] : memref<1x16xf32, #tpu.memory_space<vmem>>, vector<1x16xf32>
    %153 = vector.shape_cast %152 : vector<1x16xf32> to vector<1x1x16xf32>
    %cst_132 = arith.constant 9.99999974E-6 : f32
    %154 = vector.broadcast %cst_132 : f32 to vector<1x1x16xf32>
    %155 = arith.addf %151, %154 : vector<1x1x16xf32>
    %156 = math.rsqrt %155 : vector<1x1x16xf32>
    %157 = arith.mulf %153, %156 : vector<1x1x16xf32>
    %158 = vector.broadcast %144 : vector<1x1x16xf32> to vector<2x32x16xf32>
    %159 = arith.subf %140, %158 : vector<2x32x16xf32>
    %160 = vector.broadcast %157 : vector<1x1x16xf32> to vector<2x32x16xf32>
    %161 = arith.mulf %159, %160 : vector<2x32x16xf32>
    %c0_133 = arith.constant 0 : index
    %c0_134 = arith.constant 0 : index
    %162 = vector.load %arg16[%c0_133, %c0_134] : memref<1x16xf32, #tpu.memory_space<vmem>>, vector<1x16xf32>
    %163 = vector.shape_cast %162 : vector<1x16xf32> to vector<1x1x16xf32>
    %164 = vector.broadcast %163 : vector<1x1x16xf32> to vector<2x32x16xf32>
    %165 = arith.addf %161, %164 : vector<2x32x16xf32>
    %166 = arith.negf %165 : vector<2x32x16xf32>
    %167 = math.exp %166 : vector<2x32x16xf32>
    %cst_135 = arith.constant 1.000000e+00 : f32
    %168 = vector.broadcast %cst_135 : f32 to vector<2x32x16xf32>
    %169 = arith.addf %168, %167 : vector<2x32x16xf32>
    %170 = arith.divf %168, %169 : vector<2x32x16xf32>
    %171 = arith.mulf %165, %170 : vector<2x32x16xf32>
    %cst_136 = arith.constant 0.000000e+00 : f32
    %172 = vector.broadcast %cst_136 : f32 to vector<2x1x16xf32>
    %c0_137 = arith.constant 0 : index
    %c0_138 = arith.constant 0 : index
    %c0_139 = arith.constant 0 : index
    %173 = vector.load %arg25[%c0_137, %c0_138, %c0_139] : memref<2x34x16xf32, #tpu.memory_space<vmem>>, vector<2x1x16xf32>
    tpu.vector_store %arg25[%c0_137, %c0_138, %c0_139], %172 {strides = array<i32>} : memref<2x34x16xf32, #tpu.memory_space<vmem>>, vector<2x1x16xf32>,
    %c0_140 = arith.constant 0 : index
    %c33_141 = arith.constant 33 : index
    %c0_142 = arith.constant 0 : index
    %174 = vector.load %arg25[%c0_140, %c33_141, %c0_142] : memref<2x34x16xf32, #tpu.memory_space<vmem>>, vector<2x1x16xf32>
    tpu.vector_store %arg25[%c0_140, %c33_141, %c0_142], %172 {strides = array<i32>} : memref<2x34x16xf32, #tpu.memory_space<vmem>>, vector<2x1x16xf32>,
    %c0_143 = arith.constant 0 : index
    %c1_144 = arith.constant 1 : index
    %c0_145 = arith.constant 0 : index
    %175 = vector.load %arg25[%c0_143, %c1_144, %c0_145] : memref<2x34x16xf32, #tpu.memory_space<vmem>>, vector<2x32x16xf32>
    tpu.vector_store %arg25[%c0_143, %c1_144, %c0_145], %171 {strides = array<i32>} : memref<2x34x16xf32, #tpu.memory_space<vmem>>, vector<2x32x16xf32>,
    %c0_146 = arith.constant 0 : index
    %c0_147 = arith.constant 0 : index
    %c0_148 = arith.constant 0 : index
    %176 = tpu.strided_load %arg25[%c0_146, %c0_147, %c0_148] {strides = array<i32: 1, 2, 1>} : memref<2x34x16xf32, #tpu.memory_space<vmem>>, vector<2x16x16xf32>
    %c0_149 = arith.constant 0 : index
    %c0_150 = arith.constant 0 : index
    %c0_151 = arith.constant 0 : index
    %177 = vector.load %arg17[%c0_149, %c0_150, %c0_151] : memref<3x16x32xf32, #tpu.memory_space<vmem>>, vector<1x16x32xf32>
    %178 = vector.shape_cast %177 : vector<1x16x32xf32> to vector<16x32xf32>
    %cst_152 = arith.constant dense<0.000000e+00> : vector<2x16x32xf32>
    %179 = tpu.matmul %176, %178, %cst_152 {dimension_numbers = #tpu.dot_dimension_numbers<[2], [0], [0, 1], [1], [0, 0, 0, 1, 1, 1], [], []>} : vector<2x16x16xf32>, vector<16x32xf32>, vector<2x16x32xf32> -> vector<2x16x32xf32>
    %c0_153 = arith.constant 0 : index
    %c1_154 = arith.constant 1 : index
    %c0_155 = arith.constant 0 : index
    %180 = tpu.strided_load %arg25[%c0_153, %c1_154, %c0_155] {strides = array<i32: 1, 2, 1>} : memref<2x34x16xf32, #tpu.memory_space<vmem>>, vector<2x16x16xf32>
    %c1_156 = arith.constant 1 : index
    %c0_157 = arith.constant 0 : index
    %c0_158 = arith.constant 0 : index
    %181 = vector.load %arg17[%c1_156, %c0_157, %c0_158] : memref<3x16x32xf32, #tpu.memory_space<vmem>>, vector<1x16x32xf32>
    %182 = vector.shape_cast %181 : vector<1x16x32xf32> to vector<16x32xf32>
    %cst_159 = arith.constant dense<0.000000e+00> : vector<2x16x32xf32>
    %183 = tpu.matmul %180, %182, %cst_159 {dimension_numbers = #tpu.dot_dimension_numbers<[2], [0], [0, 1], [1], [0, 0, 0, 1, 1, 1], [], []>} : vector<2x16x16xf32>, vector<16x32xf32>, vector<2x16x32xf32> -> vector<2x16x32xf32>
    %184 = arith.addf %179, %183 : vector<2x16x32xf32>
    %c0_160 = arith.constant 0 : index
    %c2_161 = arith.constant 2 : index
    %c0_162 = arith.constant 0 : index
    %185 = tpu.strided_load %arg25[%c0_160, %c2_161, %c0_162] {strides = array<i32: 1, 2, 1>} : memref<2x34x16xf32, #tpu.memory_space<vmem>>, vector<2x16x16xf32>
    %c2_163 = arith.constant 2 : index
    %c0_164 = arith.constant 0 : index
    %c0_165 = arith.constant 0 : index
    %186 = vector.load %arg17[%c2_163, %c0_164, %c0_165] : memref<3x16x32xf32, #tpu.memory_space<vmem>>, vector<1x16x32xf32>
    %187 = vector.shape_cast %186 : vector<1x16x32xf32> to vector<16x32xf32>
    %cst_166 = arith.constant dense<0.000000e+00> : vector<2x16x32xf32>
    %188 = tpu.matmul %185, %187, %cst_166 {dimension_numbers = #tpu.dot_dimension_numbers<[2], [0], [0, 1], [1], [0, 0, 0, 1, 1, 1], [], []>} : vector<2x16x16xf32>, vector<16x32xf32>, vector<2x16x32xf32> -> vector<2x16x32xf32>
    %189 = arith.addf %184, %188 : vector<2x16x32xf32>
    %c0_167 = arith.constant 0 : index
    %c0_168 = arith.constant 0 : index
    %190 = vector.load %arg18[%c0_167, %c0_168] : memref<1x32xf32, #tpu.memory_space<vmem>>, vector<1x32xf32>
    %191 = vector.shape_cast %190 : vector<1x32xf32> to vector<1x1x32xf32>
    %192 = vector.broadcast %191 : vector<1x1x32xf32> to vector<2x16x32xf32>
    %193 = arith.addf %189, %192 : vector<2x16x32xf32>
    %cst_169 = arith.constant dense<0.000000e+00> : vector<32xf32>
    %194 = vector.multi_reduction <add>, %193, %cst_169 [0, 1] : vector<2x16x32xf32> to vector<32xf32>
    %195 = vector.shape_cast %194 : vector<32xf32> to vector<1x1x32xf32>
    %cst_170 = arith.constant 3.200000e+01 : f32
    %196 = vector.broadcast %cst_170 : f32 to vector<1x1x32xf32>
    %197 = arith.divf %195, %196 : vector<1x1x32xf32>
    %198 = vector.broadcast %197 : vector<1x1x32xf32> to vector<2x16x32xf32>
    %199 = arith.subf %193, %198 : vector<2x16x32xf32>
    %200 = arith.mulf %199, %199 : vector<2x16x32xf32>
    %cst_171 = arith.constant dense<0.000000e+00> : vector<32xf32>
    %201 = vector.multi_reduction <add>, %200, %cst_171 [0, 1] : vector<2x16x32xf32> to vector<32xf32>
    %202 = vector.shape_cast %201 : vector<32xf32> to vector<1x1x32xf32>
    %cst_172 = arith.constant 3.200000e+01 : f32
    %203 = vector.broadcast %cst_172 : f32 to vector<1x1x32xf32>
    %204 = arith.divf %202, %203 : vector<1x1x32xf32>
    %c0_173 = arith.constant 0 : index
    %c0_174 = arith.constant 0 : index
    %205 = vector.load %arg19[%c0_173, %c0_174] : memref<1x32xf32, #tpu.memory_space<vmem>>, vector<1x32xf32>
    %206 = vector.shape_cast %205 : vector<1x32xf32> to vector<1x1x32xf32>
    %cst_175 = arith.constant 9.99999974E-6 : f32
    %207 = vector.broadcast %cst_175 : f32 to vector<1x1x32xf32>
    %208 = arith.addf %204, %207 : vector<1x1x32xf32>
    %209 = math.rsqrt %208 : vector<1x1x32xf32>
    %210 = arith.mulf %206, %209 : vector<1x1x32xf32>
    %211 = vector.broadcast %197 : vector<1x1x32xf32> to vector<2x16x32xf32>
    %212 = arith.subf %193, %211 : vector<2x16x32xf32>
    %213 = vector.broadcast %210 : vector<1x1x32xf32> to vector<2x16x32xf32>
    %214 = arith.mulf %212, %213 : vector<2x16x32xf32>
    %c0_176 = arith.constant 0 : index
    %c0_177 = arith.constant 0 : index
    %215 = vector.load %arg20[%c0_176, %c0_177] : memref<1x32xf32, #tpu.memory_space<vmem>>, vector<1x32xf32>
    %216 = vector.shape_cast %215 : vector<1x32xf32> to vector<1x1x32xf32>
    %217 = vector.broadcast %216 : vector<1x1x32xf32> to vector<2x16x32xf32>
    %218 = arith.addf %214, %217 : vector<2x16x32xf32>
    %219 = arith.negf %218 : vector<2x16x32xf32>
    %220 = math.exp %219 : vector<2x16x32xf32>
    %cst_178 = arith.constant 1.000000e+00 : f32
    %221 = vector.broadcast %cst_178 : f32 to vector<2x16x32xf32>
    %222 = arith.addf %221, %220 : vector<2x16x32xf32>
    %223 = arith.divf %221, %222 : vector<2x16x32xf32>
    %224 = arith.mulf %218, %223 : vector<2x16x32xf32>
    %c0_179 = arith.constant 0 : index
    %c0_180 = arith.constant 0 : index
    %c0_181 = arith.constant 0 : index
    %225 = vector.load %arg21[%c0_179, %c0_180, %c0_181] : memref<2x16x32xf32, #tpu.memory_space<vmem>>, vector<2x16x32xf32>
    tpu.vector_store %arg21[%c0_179, %c0_180, %c0_181], %224 {strides = array<i32>} : memref<2x16x32xf32, #tpu.memory_space<vmem>>, vector<2x16x32xf32>,
    return
  }
}

</mosaic_0001>

<bundles_post_ra>
// kernel: encoder_block_forward.1
= control target key start
LH: loop header
LB: loop body
LE: loop exit
PB: predicated region body
PF: predicated region fallthrough
CT: control target
= control target key end

     0   :  { %s4762_s0 = inlined_call_operand.vmem [shape: f32[2,64,4], index: 0, kind: input, shape index: {}]   ;;  %s4763_s1 = inlined_call_operand.vmem [shape: f32[3,4,16], index: 1, kind: input, shape index: {}]   ;;  %s4764_s2 = inlined_call_operand.vmem [shape: f32[1,16], index: 2, kind: input, shape index: {}]   ;;  %s4765_s3 = inlined_call_operand.vmem [shape: f32[16,8], index: 3, kind: input, shape index: {}]   ;;  %s4766_s4 = inlined_call_operand.vmem [shape: f32[1,8], index: 4, kind: input, shape index: {}]   ;;  %s4767_s5 = inlined_call_operand.vmem [shape: f32[1,8], index: 5, kind: input, shape index: {}]   ;;  %s4768_s6 = inlined_call_operand.vmem [shape: f32[1,8], index: 6, kind: input, shape index: {}]   ;;  %s4769_s7 = inlined_call_operand.vmem [shape: f32[3,8,16], index: 7, kind: input, shape index: {}]   ;;  %s4770_s8 = inlined_call_operand.vmem [shape: f32[1,16], index: 8, kind: input, shape index: {}]   ;;  %s4771_s9 = inlined_call_operand.vmem [shape: f32[1,16], index: 9, kind: input, shape index: {}]   ;;  %s4772_s10 = inlined_call_operand.vmem [shape: f32[1,16], index: 10, kind: input, shape index: {}]   ;;  %s4773_s11 = inlined_call_operand.vmem [shape: f32[3,16,32], index: 11, kind: input, shape index: {}]   ;;  %s4774_s12 = inlined_call_operand.vmem [shape: f32[1,32], index: 12, kind: input, shape index: {}]   ;;  %s4775_s13 = inlined_call_operand.vmem [shape: f32[32,16], index: 13, kind: input, shape index: {}]   ;;  %s4776_s14 = inlined_call_operand.vmem [shape: f32[1,16], index: 14, kind: input, shape index: {}]   ;;  %s4777_s15 = inlined_call_operand.vmem [shape: f32[1,16], index: 15, kind: input, shape index: {}]   ;;  %s4778_s16 = inlined_call_operand.vmem [shape: f32[1,16], index: 16, kind: input, shape index: {}]   ;;  %s4779_s17 = inlined_call_operand.vmem [shape: f32[3,16,32], index: 17, kind: input, shape index: {}]   ;;  %s4780_s18 = inlined_call_operand.vmem [shape: f32[1,32], index: 18, kind: input, shape index: {}]   ;;  %s4781_s19 = inlined_call_operand.vmem [shape: f32[1,32], index: 19, kind: input, shape index: {}]   ;;  %s4782_s20 = inlined_call_operand.vmem [shape: f32[1,32], index: 20, kind: input, shape index: {}]   ;;  %s4783_s21 = inlined_call_operand.hbm [shape: f32[2,16,32], index: 21, kind: output, shape index: {}]  }
   0x1   :  { %4787 = sst [smem:[#allocation9_spill]] %s4762_s0 }
   0x2   :  { %4788 = sst [smem:[#allocation10_spill]] %s4763_s1 }
   0x3   :  { %4789 = sst [smem:[#allocation11_spill]] %s4764_s2 }
   0x4   :  { %4790 = sst [smem:[#allocation12_spill]] %s4765_s3 }
   0x5   :  { %4791 = sst [smem:[#allocation13_spill]] %s4766_s4 }
   0x6   :  { %4792 = sst [smem:[#allocation14_spill]] %s4767_s5 }
   0x7   :  { %s4793_s26 = sld [smem:[#allocation10_spill]]  ;;  %vm190_vm0 = vcmask 1043456   ;;  %s4794_s28 = sld [smem:[#allocation9_spill]]  ;;  %vm90_vm1 = vcmask 31744   ;;  %vm85_vm2 = vcmask 24576   ;;  %v3984_v9 = vmov 0.0  }
   0x8   :  { %86 = vst.msk [vmem:[#allocation2] sm:$0x1] %vm85_vm2, %v3984_v9  ;;  %87 = vst.msk [vmem:[#allocation2 + $0x48] sm:$0x1] %vm85_vm2, %v3984_v9 }
   0x9   :  { %88 = vst.msk [vmem:[#allocation2 + $0x41] sm:$0x1] %vm85_vm2, %v3984_v9  ;;  %89 = vst.msk [vmem:[#allocation2 + $0x89] sm:$0x1] %vm85_vm2, %v3984_v9 }
   0xd   :  { %v3099_v0 = vld [vmem:[%s4793_s26 + $0x4] sm:$0xf]  ;;  %v70_v2 = vld [vmem:[%s4794_s28 + $0x8] sm:$0xff]  ;;  %v123_v3 = vld [vmem:[%s4793_s26] sm:$0xf] }
   0xe   :  { %v69_v1 = vld [vmem:[%s4794_s28] sm:$0xff]  ;;  %3448 = vmatprep.subr.msk.mxu0 %vm190_vm0, %v3099_v0  ;;  %92 = vst.msk [vmem:[#allocation2 + $0x9] sm:$0xff] %vm90_vm1, %v70_v2  ;;  %v71_v4 = vld [vmem:[%s4794_s28 + $0x10] sm:$0xff]  ;;  %v72_v5 = vld [vmem:[%s4794_s28 + $0x18] sm:$0xff]  ;;  %3730 = vmatprep.subr.msk.mxu1 %vm190_vm0, %v3099_v0 }
   0xf   :  { %91 = vst.msk [vmem:[#allocation2 + $0x1] sm:$0xff] %vm90_vm1, %v69_v1  ;;  %3449 = vmatpush3.msk.msra.mxu0 %vm190_vm0, %v3099_v0  ;;  %93 = vst.msk [vmem:[#allocation2 + $0x11] sm:$0xff] %vm90_vm1, %v71_v4  ;;  %v73_v6 = vld [vmem:[%s4794_s28 + $0x20] sm:$0xff]  ;;  %v74_v7 = vld [vmem:[%s4794_s28 + $0x28] sm:$0xff]  ;;  %3731 = vmatpush3.msk.msra.mxu1 %vm190_vm0, %v3099_v0 }
  0x10   :  { %94 = vst.msk [vmem:[#allocation2 + $0x19] sm:$0xff] %vm90_vm1, %v72_v5  ;;  %v75_v8 = vld [vmem:[%s4794_s28 + $0x30] sm:$0xff]  ;;  %3474 = vmatprep.subr.msk.mxu0 %vm190_vm0, %v123_v3  ;;  %95 = vst.msk [vmem:[#allocation2 + $0x21] sm:$0xff] %vm90_vm1, %v73_v6  ;;  %v76_v10 = vld [vmem:[%s4794_s28 + $0x38] sm:$0xff] }
  0x11   :  { %96 = vst.msk [vmem:[#allocation2 + $0x29] sm:$0xff] %vm90_vm1, %v74_v7  ;;  %97 = vst.msk [vmem:[#allocation2 + $0x31] sm:$0xff] %vm90_vm1, %v75_v8  ;;  %v77_v11 = vld [vmem:[%s4794_s28 + $0x40] sm:$0xff]  ;;  %v78_v12 = vld [vmem:[%s4794_s28 + $0x48] sm:$0xff] }
  0x12   :  { %98 = vst.msk [vmem:[#allocation2 + $0x39] sm:$0xff] %vm90_vm1, %v76_v10  ;;  %99 = vst.msk [vmem:[#allocation2 + $0x49] sm:$0xff] %vm90_vm1, %v77_v11  ;;  %v79_v13 = vld [vmem:[%s4794_s28 + $0x50] sm:$0xff]  ;;  %v80_v14 = vld [vmem:[%s4794_s28 + $0x58] sm:$0xff] }
  0x13   :  { %100 = vst.msk [vmem:[#allocation2 + $0x51] sm:$0xff] %vm90_vm1, %v78_v12  ;;  %v81_v15 = vld [vmem:[%s4794_s28 + $0x60] sm:$0xff]  ;;  %101 = vst.msk [vmem:[#allocation2 + $0x59] sm:$0xff] %vm90_vm1, %v79_v13  ;;  %v82_v16 = vld [vmem:[%s4794_s28 + $0x68] sm:$0xff] }
  0x14   :  { %102 = vst.msk [vmem:[#allocation2 + $0x61] sm:$0xff] %vm90_vm1, %v80_v14  ;;  %103 = vst.msk [vmem:[#allocation2 + $0x69] sm:$0xff] %vm90_vm1, %v81_v15  ;;  %v83_v17 = vld [vmem:[%s4794_s28 + $0x70] sm:$0xff]  ;;  %v84_v18 = vld [vmem:[%s4794_s28 + $0x78] sm:$0xff] }
  0x15   :  { %104 = vst.msk [vmem:[#allocation2 + $0x71] sm:$0xff] %vm90_vm1, %v82_v16  ;;  %105 = vst.msk [vmem:[#allocation2 + $0x79] sm:$0xff] %vm90_vm1, %v83_v17 }
  0x16   :  { %26 = vsyncpa [#allocation7], 0  ;;  %106 = vst.msk [vmem:[#allocation2 + $0x81] sm:$0xff] %vm90_vm1, %v84_v18  ;;  %v124_v19 = vld [vmem:[#allocation2 + $0x1] sm:$0xff]  ;;  %v125_v20 = vld [vmem:[#allocation2 + $0x9] sm:$0xff]  ;;  %s4795_s24 = sld [smem:[#allocation12_spill]] }
  0x17   :  { %3450 = vmatprep.mubr.msk.f32.mxu0 %vm90_vm1, %v124_v19  ;;  %v126_v21 = vld [vmem:[#allocation2 + $0x11] sm:$0xff]  ;;  %v3134_v22 = vld [vmem:[%s4793_s26 + $0x8] sm:$0xf]  ;;  %v127_v23 = vld [vmem:[#allocation2 + $0x19] sm:$0xff]  ;;  %s4796_s29 = sld [smem:[#allocation11_spill]]  ;;  %vm797_vm3 = vcmask 130048  }
  0x18   :  { %3451 = vmatmul.mubr.msk.f32.vlgmr.msra.gmra.mrb[0].mxu0 %vm90_vm1, %v125_v20  ;;  %v128_v24 = vld [vmem:[#allocation2 + $0x21] sm:$0xff]  ;;  %v129_v25 = vld [vmem:[#allocation2 + $0x29] sm:$0xff]  ;;  %v130_v26 = vld [vmem:[#allocation2 + $0x31] sm:$0xff]  ;;  %s4797_s30 = sld [smem:[#allocation13_spill]]  ;;  %vm991_vm4 = vcmask 64512   ;;  %vm1262_vm5 = vcmask 57344  }
  0x19   :  { %3475 = vmatpush3.msk.msra.mxu0 %vm190_vm0, %v123_v3  ;;  %3453 = vmatprep.mubr.msk.f32.mxu0 %vm90_vm1, %v126_v21  ;;  %v131_v27 = vld [vmem:[#allocation2 + $0x39] sm:$0xff]  ;;  %v132_v28 = vld [vmem:[#allocation2 + $0x49] sm:$0xff]  ;;  %1263 = vst.msk [vmem:[#allocation3] sm:$0x1] %vm1262_vm5, %v3984_v9  ;;  %1264 = vst.msk [vmem:[#allocation3 + $0x48] sm:$0x1] %vm1262_vm5, %v3984_v9 }
  0x1a   :  { %3500 = vmatprep.subr.msk.mxu0 %vm190_vm0, %v3134_v22  ;;  %v133_v30 = vld [vmem:[#allocation2 + $0x51] sm:$0xff]  ;;  %v134_v32 = vld [vmem:[#allocation2 + $0x59] sm:$0xff]  ;;  %v108_v37 = vld [vmem:[#allocation2 + $0x8] sm:$0xff]  ;;  %vm1895_vm6 = vcmask 122880   ;;  %vm2361_vm7 = vcmask 261120  }
  0x1b   :  { %v135_v33 = vld [vmem:[#allocation2 + $0x61] sm:$0xff]  ;;  %v136_v34 = vld [vmem:[#allocation2 + $0x69] sm:$0xff]  ;;  %v110_v39 = vld [vmem:[#allocation2 + $0x18] sm:$0xff]  ;;  %1896 = vst.msk [vmem:[#allocation4] sm:$0x1] %vm1895_vm6, %v3984_v9 }
  0x1c   :  { %3454 = vmatmul.mubr.msk.f32.gmra.mrb[2].mxu0 %vm90_vm1, %v127_v23  ;;  %v138_v29 = vld [vmem:[#allocation2 + $0x79] sm:$0xff]  ;;  %v137_v35 = vld [vmem:[#allocation2 + $0x71] sm:$0xff]  ;;  %v112_v41 = vld [vmem:[#allocation2 + $0x28] sm:$0xff]  ;;  %1897 = vst.msk [vmem:[#allocation4 + $0x28] sm:$0x1] %vm1895_vm6, %v3984_v9 }
  0x1d   :  { %3456 = vmatprep.mubr.msk.f32.mxu0 %vm90_vm1, %v128_v24  ;;  %3471 = vmatprep.mubr.msk.f32.mxu1 %vm90_vm1, %v138_v29  ;;  %v139_v31 = vld [vmem:[#allocation2 + $0x81] sm:$0xff]  ;;  %v109_v38 = vld [vmem:[#allocation2 + $0x10] sm:$0xff]  ;;  %v114_v43 = vld [vmem:[#allocation2 + $0x38] sm:$0xff]  ;;  %1898 = vst.msk [vmem:[#allocation4 + $0x21] sm:$0x1] %vm1895_vm6, %v3984_v9 }
  0x1e   :  { %3472 = vmatmul.mubr.msk.f32.vlgmr.msra.gmra.mrb[0].mxu1 %vm90_vm1, %v139_v31  ;;  %v107_v36 = vld [vmem:[#allocation2] sm:$0xff]  ;;  %v113_v42 = vld [vmem:[#allocation2 + $0x30] sm:$0xff]  ;;  %v115_v44 = vld [vmem:[#allocation2 + $0x48] sm:$0xff]  ;;  %1899 = vst.msk [vmem:[#allocation4 + $0x49] sm:$0x1] %vm1895_vm6, %v3984_v9 }
  0x1f   :  { %v111_v40 = vld [vmem:[#allocation2 + $0x20] sm:$0xff]  ;;  %v116_v45 = vld [vmem:[#allocation2 + $0x50] sm:$0xff]  ;;  %v117_v46 = vld [vmem:[#allocation2 + $0x58] sm:$0xff]  ;;  %2640 = vst.msk [vmem:[#allocation5] sm:$0x1] %vm1895_vm6, %v3984_v9 }
  0x20   :  { %3457 = vmatmul.mubr.msk.f32.gmra.mrb[4].mxu0 %vm90_vm1, %v129_v25  ;;  %v118_v47 = vld [vmem:[#allocation2 + $0x60] sm:$0xff]  ;;  %v119_v48 = vld [vmem:[#allocation2 + $0x68] sm:$0xff]  ;;  %v120_v49 = vld [vmem:[#allocation2 + $0x70] sm:$0xff]  ;;  %2641 = vst.msk [vmem:[#allocation5 + $0x28] sm:$0x1] %vm1895_vm6, %v3984_v9 }
  0x21   :  { %3459 = vmatprep.mubr.msk.f32.mxu0 %vm90_vm1, %v130_v26  ;;  %v121_v50 = vld [vmem:[#allocation2 + $0x78] sm:$0xff]  ;;  %v122_v51 = vld [vmem:[#allocation2 + $0x80] sm:$0xff]  ;;  %v536_v53 = vld [vmem:[#allocation2 + $0xa] sm:$0xff] }
  0x22   :  { %v535_v52 = vld [vmem:[#allocation2 + $0x2] sm:$0xff]  ;;  %v537_v54 = vld [vmem:[#allocation2 + $0x12] sm:$0xff]  ;;  %v538_v55 = vld [vmem:[#allocation2 + $0x1a] sm:$0xff] }
  0x23   :  { %v539_v56 = vld [vmem:[#allocation2 + $0x22] sm:$0xff]  ;;  %v540_v57 = vld [vmem:[#allocation2 + $0x2a] sm:$0xff]  ;;  %v541_v58 = vld [vmem:[#allocation2 + $0x32] sm:$0xff] }
  0x24   :  { %3460 = vmatmul.mubr.msk.f32.gmra.mrb[6].mxu0 %vm90_vm1, %v131_v27  ;;  %v542_v59 = vld [vmem:[#allocation2 + $0x3a] sm:$0xff]  ;;  %v543_v60 = vld [vmem:[#allocation2 + $0x4a] sm:$0xff]  ;;  %v544_v61 = vld [vmem:[#allocation2 + $0x52] sm:$0xff] }
  0x25   :  { %3462 = vmatprep.mubr.msk.f32.mxu0 %vm90_vm1, %v132_v28  ;;  %v545_v62 = vld [vmem:[#allocation2 + $0x5a] sm:$0xff]  ;;  %v546_v63 = vld [vmem:[#allocation2 + $0x62] sm:$0xff]  ;;  %v547_v0 = vld [vmem:[#allocation2 + $0x6a] sm:$0xff] }
  0x26   :  { %v548_v1 = vld [vmem:[#allocation2 + $0x72] sm:$0xff]  ;;  %v549_v2 = vld [vmem:[#allocation2 + $0x7a] sm:$0xff]  ;;  %v550_v3 = vld [vmem:[#allocation2 + $0x82] sm:$0xff] }
  0x27   :  { %v788_v4 = vld [vmem:[%s4795_s24] sm:$0xff]  ;;  %v789_v5 = vld [vmem:[%s4795_s24 + $0x8] sm:$0xff]  ;;  %s4798_s24 = sld [smem:[#allocation14_spill]] }
  0x28   :  { %3463 = vmatmul.mubr.msk.f32.gmra.mrb[8].mxu0 %vm90_vm1, %v133_v30  ;;  %v3694_v6 = vpack.c.bf16 %v789_v5, %v788_v4  ;;  %v3152_v10 = vld [vmem:[%s4796_s29] ss:$0 sm:$0xff] }
  0x29   :  { %3465 = vmatprep.mubr.msk.f32.mxu0 %vm90_vm1, %v134_v32 }
  0x2a   :  { %3695 = vmatprep.subr.bf16.mxu1 %v3694_v6 }
  0x2b   :  { %3697 = vmatpush3.bf16.msra.mxu1 %v3694_v6 }
  0x2c   :  { %3466 = vmatmul.mubr.msk.f32.gmra.mrb[10].mxu0 %vm90_vm1, %v135_v33 }
  0x2d   :  { %3468 = vmatprep.mubr.msk.f32.mxu0 %vm90_vm1, %v136_v34 }
  0x30   :  { %3469 = vmatmul.mubr.msk.f32.gmra.mrb[12].mxu0 %vm90_vm1, %v137_v35 }
  0x31   :  { %3476 = vmatprep.mubr.msk.f32.mxu0 %vm90_vm1, %v107_v36 }
  0x34   :  { %3477 = vmatmul.mubr.msk.f32.vlgmr.msra.gmra.mrb[0].mxu0 %vm90_vm1, %v108_v37 }
  0x35   :  { %3501 = vmatpush3.msk.msra.mxu0 %vm190_vm0, %v3134_v22  ;;  %3479 = vmatprep.mubr.msk.f32.mxu0 %vm90_vm1, %v109_v38 }
  0x38   :  { %3480 = vmatmul.mubr.msk.f32.gmra.mrb[2].mxu0 %vm90_vm1, %v110_v39 }
  0x39   :  { %3482 = vmatprep.mubr.msk.f32.mxu0 %vm90_vm1, %v111_v40 }
  0x3c   :  { %3483 = vmatmul.mubr.msk.f32.gmra.mrb[4].mxu0 %vm90_vm1, %v112_v41 }
  0x3d   :  { %3485 = vmatprep.mubr.msk.f32.mxu0 %vm90_vm1, %v113_v42 }
  0x40   :  { %3486 = vmatmul.mubr.msk.f32.gmra.mrb[6].mxu0 %vm90_vm1, %v114_v43 }
  0x41   :  { %3488 = vmatprep.mubr.msk.f32.mxu0 %vm90_vm1, %v115_v44 }
  0x44   :  { %3489 = vmatmul.mubr.msk.f32.gmra.mrb[8].mxu0 %vm90_vm1, %v116_v45  ;;  %v3153_v45 = vld [vmem:[%s4797_s30] ss:$0 sm:$0xff] }
  0x45   :  { %3491 = vmatprep.mubr.msk.f32.mxu0 %vm90_vm1, %v117_v46 }
  0x48   :  { %3492 = vmatmul.mubr.msk.f32.gmra.mrb[10].mxu0 %vm90_vm1, %v118_v47 }
  0x49   :  { %3494 = vmatprep.mubr.msk.f32.mxu0 %vm90_vm1, %v119_v48 }
  0x4c   :  { %3495 = vmatmul.mubr.msk.f32.gmra.mrb[12].mxu0 %vm90_vm1, %v120_v49 }
  0x4d   :  { %3497 = vmatprep.mubr.msk.f32.mxu0 %vm90_vm1, %v121_v50 }
  0x50   :  { %3498 = vmatmul.mubr.msk.f32.gmra.mrb[14].mxu0 %vm90_vm1, %v122_v51 }
  0x51   :  { %3502 = vmatprep.mubr.msk.f32.mxu0 %vm90_vm1, %v535_v52 }
  0x54   :  { %3503 = vmatmul.mubr.msk.f32.vlgmr.msra.gmra.mrb[0].mxu0 %vm90_vm1, %v536_v53 }
  0x55   :  { %3505 = vmatprep.mubr.msk.f32.mxu0 %vm90_vm1, %v537_v54 }
  0x58   :  { %3506 = vmatmul.mubr.msk.f32.gmra.mrb[2].mxu0 %vm90_vm1, %v538_v55 }
  0x59   :  { %3508 = vmatprep.mubr.msk.f32.mxu0 %vm90_vm1, %v539_v56 }
  0x5c   :  { %3509 = vmatmul.mubr.msk.f32.gmra.mrb[4].mxu0 %vm90_vm1, %v540_v57 }
  0x5d   :  { %3511 = vmatprep.mubr.msk.f32.mxu0 %vm90_vm1, %v541_v58 }
  0x60   :  { %3512 = vmatmul.mubr.msk.f32.gmra.mrb[6].mxu0 %vm90_vm1, %v542_v59 }
  0x61   :  { %3514 = vmatprep.mubr.msk.f32.mxu0 %vm90_vm1, %v543_v60 }
  0x64   :  { %3515 = vmatmul.mubr.msk.f32.gmra.mrb[8].mxu0 %vm90_vm1, %v544_v61 }
  0x65   :  { %3517 = vmatprep.mubr.msk.f32.mxu0 %vm90_vm1, %v545_v62 }
  0x68   :  { %3518 = vmatmul.mubr.msk.f32.gmra.mrb[10].mxu0 %vm90_vm1, %v546_v63 }
  0x69   :  { %3520 = vmatprep.mubr.msk.f32.mxu0 %vm90_vm1, %v547_v0 }
  0x6c   :  { %3521 = vmatmul.mubr.msk.f32.gmra.mrb[12].mxu0 %vm90_vm1, %v548_v1 }
  0x6d   :  { %3523 = vmatprep.mubr.msk.f32.mxu0 %vm90_vm1, %v549_v2 }
  0x70   :  { %3524 = vmatmul.mubr.msk.f32.gmra.mrb[14].mxu0 %vm90_vm1, %v550_v3 }
  0xf1   :  { %v3473_v7 = vpop.f32.mrb[0].mxu1 }
  0xf2   :  { %v330_v8 = vpop.f32.mrb[1].mxu1 }
 0x127   :  { %v3504_v11 = vpop.f32.mrb[0].mxu0 }
 0x128   :  { %v670_v12 = vpop.f32.mrb[1].mxu0  ;;  %v773_v14 = vadd.f32 %v3504_v11, %v3152_v10 }
 0x129   :  { %v772_v13 = vadd.f32 %v3152_v10, %v670_v12 }
 0x12b   :  { %v3507_v15 = vpop.f32.mrb[2].mxu0  ;;  %3530 = vmatprep.mubr.msk.f32.mxu1 %vm797_vm3, %v772_v13 }
 0x12c   :  { %v680_v16 = vpop.f32.mrb[3].mxu0  ;;  %3531 = vmatmul.mubr.msk.f32.vlgmr.msra.gmra.mrb[2].mxu1 %vm797_vm3, %v773_v14  ;;  %v775_v18 = vadd.f32 %v3507_v15, %v3152_v10 }
 0x12d   :  { %v774_v17 = vadd.f32 %v3152_v10, %v680_v16 }
 0x12f   :  { %v3510_v19 = vpop.f32.mrb[4].mxu0  ;;  %3533 = vmatprep.mubr.msk.f32.mxu1 %vm797_vm3, %v774_v17 }
 0x130   :  { %v690_v20 = vpop.f32.mrb[5].mxu0  ;;  %3534 = vmatmul.mubr.msk.f32.gmra.mrb[4].mxu1 %vm797_vm3, %v775_v18  ;;  %v777_v22 = vadd.f32 %v3510_v19, %v3152_v10 }
 0x131   :  { %v776_v21 = vadd.f32 %v3152_v10, %v690_v20 }
 0x133   :  { %v3513_v23 = vpop.f32.mrb[6].mxu0  ;;  %3536 = vmatprep.mubr.msk.f32.mxu1 %vm797_vm3, %v776_v21 }
 0x134   :  { %v700_v24 = vpop.f32.mrb[7].mxu0  ;;  %3537 = vmatmul.mubr.msk.f32.gmra.mrb[6].mxu1 %vm797_vm3, %v777_v22  ;;  %v779_v26 = vadd.f32 %v3513_v23, %v3152_v10 }
 0x135   :  { %v778_v25 = vadd.f32 %v3152_v10, %v700_v24 }
 0x137   :  { %v3516_v27 = vpop.f32.mrb[8].mxu0  ;;  %3539 = vmatprep.mubr.msk.f32.mxu1 %vm797_vm3, %v778_v25 }
 0x138   :  { %v710_v28 = vpop.f32.mrb[9].mxu0  ;;  %3540 = vmatmul.mubr.msk.f32.gmra.mrb[8].mxu1 %vm797_vm3, %v779_v26  ;;  %v781_v30 = vadd.f32 %v3516_v27, %v3152_v10 }
 0x139   :  { %v780_v29 = vadd.f32 %v3152_v10, %v710_v28 }
 0x13b   :  { %v3519_v31 = vpop.f32.mrb[10].mxu0  ;;  %3542 = vmatprep.mubr.msk.f32.mxu1 %vm797_vm3, %v780_v29 }
 0x13c   :  { %v720_v32 = vpop.f32.mrb[11].mxu0  ;;  %3543 = vmatmul.mubr.msk.f32.gmra.mrb[10].mxu1 %vm797_vm3, %v781_v30  ;;  %v783_v34 = vadd.f32 %v3519_v31, %v3152_v10 }
 0x13d   :  { %v782_v33 = vadd.f32 %v3152_v10, %v720_v32 }
 0x13f   :  { %v3522_v35 = vpop.f32.mrb[12].mxu0  ;;  %3545 = vmatprep.mubr.msk.f32.mxu1 %vm797_vm3, %v782_v33 }
 0x140   :  { %v730_v36 = vpop.f32.mrb[13].mxu0  ;;  %3546 = vmatmul.mubr.msk.f32.gmra.mrb[12].mxu1 %vm797_vm3, %v783_v34  ;;  %v785_v38 = vadd.f32 %v3522_v35, %v3152_v10 }
 0x141   :  { %v784_v37 = vadd.f32 %v3152_v10, %v730_v36 }
 0x143   :  { %v3525_v39 = vpop.f32.mrb[14].mxu0  ;;  %3548 = vmatprep.mubr.msk.f32.mxu1 %vm797_vm3, %v784_v37 }
 0x144   :  { %v3732_v40 = vadd.f32 %v3525_v39, %v3473_v7  ;;  %v740_v41 = vpop.f32.mrb[15].mxu0  ;;  %3549 = vmatmul.mubr.msk.f32.gmra.mrb[14].mxu1 %vm797_vm3, %v785_v38 }
 0x145   :  { %v3733_v42 = vadd.f32 %v740_v41, %v330_v8 }
 0x146   :  { %v787_v44 = vadd.f32 %v3732_v40, %v3152_v10 }
 0x147   :  { %v786_v43 = vadd.f32 %v3733_v42, %v3152_v10 }
 0x149   :  { %3551 = vmatprep.mubr.msk.f32.mxu1 %vm797_vm3, %v786_v43 }
 0x14a   :  { %3552 = vmatmul.mubr.msk.f32.gmra.mrb[16].mxu1 %vm797_vm3, %v787_v44 }
 0x1ff   :  { %v3532_v46 = vpop.f32.mrb[2].mxu1 }
 0x200   :  { %v4259_v47 = vadd.f32 %v3532_v46, %v3153_v45  ;;  %v912_v48 = vpop.f32.mrb[3].mxu1 }
 0x201   :  { %v4261_v49 = vadd.f32 %v3153_v45, %v912_v48 }
 0x202   :  { %v993_v50 = vsel %vm991_vm4, %v4259_v47, 0.0 }
 0x203   :  { %v992_v51 = vsel %vm991_vm4, %v4261_v49, 0.0  ;;  %v3535_v52 = vpop.f32.mrb[4].mxu1 }
 0x204   :  { %v994_v53 = vadd.f32 %v993_v50, %v992_v51  ;;  %v922_v54 = vpop.f32.mrb[5].mxu1  ;;  %v4267_v55 = vadd.f32 %v3535_v52, %v3153_v45  ;;  %v3187_v52 = vld [vmem:[%s4769_s7 + $0x8] sm:$0xff] }
 0x205   :  { %v4269_v56 = vadd.f32 %v3153_v45, %v922_v54  ;;  %3554 = vmatprep.subr.mxu1 %v3187_v52 }
 0x206   :  { %v997_v61 = vsel %vm991_vm4, %v4267_v55, 0.0  ;;  %3555 = vmatpush3.msra.mxu1 %v3187_v52 }
 0x207   :  { %v995_v57 = vsel %vm991_vm4, %v4269_v56, 0.0  ;;  %v3538_v58 = vpop.f32.mrb[6].mxu1 }
 0x208   :  { %v996_v59 = vadd.f32 %v995_v57, %v994_v53  ;;  %v932_v60 = vpop.f32.mrb[7].mxu1  ;;  %v938_v62 = vadd.f32 %v3538_v58, %v3153_v45 }
 0x209   :  { %v933_v63 = vadd.f32 %v3153_v45, %v932_v60 }
 0x20a   :  { %v998_v0 = vadd.f32 %v997_v61, %v996_v59  ;;  %v1001_v5 = vsel %vm991_vm4, %v938_v62, 0.0 }
 0x20b   :  { %v999_v1 = vsel %vm991_vm4, %v933_v63, 0.0  ;;  %v3541_v2 = vpop.f32.mrb[8].mxu1 }
 0x20c   :  { %v1000_v3 = vadd.f32 %v999_v1, %v998_v0  ;;  %v942_v4 = vpop.f32.mrb[9].mxu1  ;;  %v948_v6 = vadd.f32 %v3541_v2, %v3153_v45 }
 0x20d   :  { %v943_v7 = vadd.f32 %v3153_v45, %v942_v4 }
 0x20e   :  { %v1002_v8 = vadd.f32 %v1001_v5, %v1000_v3  ;;  %v1005_v14 = vsel %vm991_vm4, %v948_v6, 0.0 }
 0x20f   :  { %v1003_v10 = vsel %vm991_vm4, %v943_v7, 0.0  ;;  %v3544_v11 = vpop.f32.mrb[10].mxu1 }
 0x210   :  { %v1004_v12 = vadd.f32 %v1003_v10, %v1002_v8  ;;  %v952_v13 = vpop.f32.mrb[11].mxu1  ;;  %v958_v15 = vadd.f32 %v3544_v11, %v3153_v45 }
 0x211   :  { %v953_v16 = vadd.f32 %v3153_v45, %v952_v13 }
 0x212   :  { %v1006_v17 = vadd.f32 %v1005_v14, %v1004_v12  ;;  %v1009_v22 = vsel %vm991_vm4, %v958_v15, 0.0 }
 0x213   :  { %v1007_v18 = vsel %vm991_vm4, %v953_v16, 0.0  ;;  %v3547_v19 = vpop.f32.mrb[12].mxu1 }
 0x214   :  { %v1008_v20 = vadd.f32 %v1007_v18, %v1006_v17  ;;  %v962_v21 = vpop.f32.mrb[13].mxu1  ;;  %v968_v23 = vadd.f32 %v3547_v19, %v3153_v45 }
 0x215   :  { %v963_v24 = vadd.f32 %v3153_v45, %v962_v21 }
 0x216   :  { %v1010_v25 = vadd.f32 %v1009_v22, %v1008_v20  ;;  %v1013_v30 = vsel %vm991_vm4, %v968_v23, 0.0  ;;  %v4350_v22 = vld [vmem:[%s4769_s7] sm:$0xff] }
 0x217   :  { %v1011_v26 = vsel %vm991_vm4, %v963_v24, 0.0  ;;  %v3550_v27 = vpop.f32.mrb[14].mxu1  ;;  %3568 = vmatprep.subr.mxu1 %v4350_v22 }
 0x218   :  { %v1012_v28 = vadd.f32 %v1011_v26, %v1010_v25  ;;  %v972_v29 = vpop.f32.mrb[15].mxu1  ;;  %v978_v31 = vadd.f32 %v3550_v27, %v3153_v45 }
 0x219   :  { %v973_v32 = vadd.f32 %v3153_v45, %v972_v29 }
 0x21a   :  { %v1014_v33 = vadd.f32 %v1013_v30, %v1012_v28  ;;  %v1017_v36 = vsel %vm991_vm4, %v978_v31, 0.0 }
 0x21b   :  { %v1015_v34 = vsel %vm991_vm4, %v973_v32, 0.0 }
 0x21c   :  { %v1016_v35 = vadd.f32 %v1015_v34, %v1014_v33 }
 0x21d   :  { %v3553_v37 = vpop.f32.mrb[16].mxu1 }
 0x21e   :  { %v982_v38 = vpop.f32.mrb[17].mxu1  ;;  %v1018_v39 = vadd.f32 %v1017_v36, %v1016_v35  ;;  %v988_v40 = vadd.f32 %v3553_v37, %v3153_v45 }
 0x21f   :  { %v983_v41 = vadd.f32 %v3153_v45, %v982_v38 }
 0x220   :  { %v1021_v44 = vsel %vm991_vm4, %v988_v40, 0.0 }
 0x221   :  { %v1019_v42 = vsel %vm991_vm4, %v983_v41, 0.0 }
 0x222   :  { %v1020_v43 = vadd.f32 %v1019_v42, %v1018_v39 }
 0x224   :  { %v1022_v46 = vadd.f32 %v1021_v44, %v1020_v43 }
 0x226   :  { %v1023_v48 = vrot.slane %v1022_v46, 4 }
 0x228   :  { %v1024_v50 = vadd.f32 %v1023_v48, %v1022_v46 }
 0x22a   :  { %v1025_v51 = vrot.slane %v1024_v50, 2 }
 0x22c   :  { %v1026_v53 = vadd.f32 %v1025_v51, %v1024_v50 }
 0x22e   :  { %v1027_v54 = vrot.slane %v1026_v53, 1 }
 0x230   :  { %v1028_v57 = vadd.f32 %v1027_v54, %v1026_v53 }
 0x232   :  { %v1030_v58 = vmul.f32 0.0078125, %v1028_v57 }
 0x234   :  { %v4291_v45 = vsub.f32 %v4261_v49, %v1030_v58  ;;  %v4294_v59 = vsub.f32 %v4259_v47, %v1030_v58  ;;  %v4297_v60 = vsub.f32 %v4269_v56, %v1030_v58  ;;  %v4300_v61 = vsub.f32 %v4267_v55, %v1030_v58 }
 0x235   :  { %v4302_v0 = vsub.f32 %v933_v63, %v1030_v58  ;;  %v4304_v1 = vsub.f32 %v938_v62, %v1030_v58  ;;  %v4306_v2 = vsub.f32 %v943_v7, %v1030_v58  ;;  %v4308_v3 = vsub.f32 %v948_v6, %v1030_v58 }
 0x236   :  { %v4310_v4 = vsub.f32 %v953_v16, %v1030_v58  ;;  %v4312_v49 = vsub.f32 %v958_v15, %v1030_v58  ;;  %v4314_v47 = vsub.f32 %v963_v24, %v1030_v58  ;;  %v4316_v5 = vsub.f32 %v968_v23, %v1030_v58 }
 0x237   :  { %v4318_v56 = vsub.f32 %v973_v32, %v1030_v58  ;;  %v4320_v55 = vsub.f32 %v978_v31, %v1030_v58  ;;  %v4322_v63 = vsub.f32 %v983_v41, %v1030_v58  ;;  %v4324_v62 = vsub.f32 %v988_v40, %v1030_v58 }
 0x238   :  { %v1047_v6 = vmul.f32 %v4291_v45, %v4291_v45  ;;  %v1048_v7 = vmul.f32 %v4294_v59, %v4294_v59  ;;  %v1049_v8 = vmul.f32 %v4297_v60, %v4297_v60  ;;  %v1050_v10 = vmul.f32 %v4300_v61, %v4300_v61 }
 0x239   :  { %v1051_v14 = vmul.f32 %v4302_v0, %v4302_v0  ;;  %v1052_v17 = vmul.f32 %v4304_v1, %v4304_v1  ;;  %v1053_v20 = vmul.f32 %v4306_v2, %v4306_v2  ;;  %v1054_v24 = vmul.f32 %v4308_v3, %v4308_v3 }
 0x23a   :  { %v1063_v11 = vsel %vm991_vm4, %v1047_v6, 0.0  ;;  %v1064_v12 = vsel %vm991_vm4, %v1048_v7, 0.0  ;;  %v1066_v15 = vsel %vm991_vm4, %v1049_v8, 0.0  ;;  %v1068_v18 = vsel %vm991_vm4, %v1050_v10, 0.0 }
 0x23b   :  { %v1065_v13 = vadd.f32 %v1064_v12, %v1063_v11  ;;  %v1070_v21 = vsel %vm991_vm4, %v1051_v14, 0.0  ;;  %v1072_v25 = vsel %vm991_vm4, %v1052_v17, 0.0  ;;  %v1055_v27 = vmul.f32 %v4310_v4, %v4310_v4 }
 0x23c   :  { %v1074_v28 = vsel %vm991_vm4, %v1053_v20, 0.0  ;;  %v1056_v30 = vmul.f32 %v4312_v49, %v4312_v49  ;;  %v1076_v31 = vsel %vm991_vm4, %v1054_v24, 0.0  ;;  %v1057_v33 = vmul.f32 %v4314_v47, %v4314_v47 }
 0x23d   :  { %v1067_v16 = vadd.f32 %v1066_v15, %v1065_v13  ;;  %v1078_v34 = vsel %vm991_vm4, %v1055_v27, 0.0  ;;  %v1058_v36 = vmul.f32 %v4316_v5, %v4316_v5  ;;  %v1059_v39 = vmul.f32 %v4318_v56, %v4318_v56 }
 0x23e   :  { %v1080_v37 = vsel %vm991_vm4, %v1056_v30, 0.0  ;;  %v1082_v40 = vsel %vm991_vm4, %v1057_v33, 0.0  ;;  %v1060_v42 = vmul.f32 %v4320_v55, %v4320_v55  ;;  %v1061_v46 = vmul.f32 %v4322_v63, %v4322_v63  ;;  %v4405_v30 = vld [vmem:[%s4768_s6] ss:$0 sm:$0xff] }
 0x23f   :  { %v1069_v19 = vadd.f32 %v1068_v18, %v1067_v16  ;;  %v1084_v43 = vsel %vm991_vm4, %v1058_v36, 0.0  ;;  %v1086_v48 = vsel %vm991_vm4, %v1059_v39, 0.0  ;;  %v1062_v51 = vmul.f32 %v4324_v62, %v4324_v62  ;;  %v1101_v18 = vld [vmem:[%s4798_s24] sm:$0x1] }
 0x240   :  { %v1088_v52 = vsel %vm991_vm4, %v1060_v42, 0.0  ;;  %v1090_v54 = vsel %vm991_vm4, %v1061_v46, 0.0  ;;  %v1106_v16 = vlaneseq }
 0x241   :  { %v1071_v23 = vadd.f32 %v1070_v21, %v1069_v19  ;;  %v1092_v58 = vsel %vm991_vm4, %v1062_v51, 0.0 }
 0x242   :  { %v1107_v17 = vshrl.u32 %v1106_v16, 7 }
 0x243   :  { %v1073_v26 = vadd.f32 %v1072_v25, %v1071_v23 }
 0x244   :  { %v4385_v19 = vsub.s32 0, %v1107_v17 }
 0x245   :  { %v1075_v29 = vadd.f32 %v1074_v28, %v1073_v26 }
 0x247   :  { %v1077_v32 = vadd.f32 %v1076_v31, %v1075_v29 }
 0x249   :  { %v1079_v35 = vadd.f32 %v1078_v34, %v1077_v32 }
 0x24b   :  { %v1081_v38 = vadd.f32 %v1080_v37, %v1079_v35 }
 0x24d   :  { %v1083_v41 = vadd.f32 %v1082_v40, %v1081_v38 }
 0x24f   :  { %v1085_v44 = vadd.f32 %v1084_v43, %v1083_v41 }
 0x251   :  { %v1087_v50 = vadd.f32 %v1086_v48, %v1085_v44 }
 0x253   :  { %v1089_v53 = vadd.f32 %v1088_v52, %v1087_v50 }
 0x255   :  { %v1091_v57 = vadd.f32 %v1090_v54, %v1089_v53 }
 0x257   :  { %v1093_v6 = vadd.f32 %v1092_v58, %v1091_v57 }
 0x259   :  { %v1094_v7 = vrot.slane %v1093_v6, 4 }
 0x25b   :  { %v1095_v8 = vadd.f32 %v1094_v7, %v1093_v6 }
 0x25d   :  { %v1096_v10 = vrot.slane %v1095_v8, 2 }
 0x25f   :  { %v1097_v11 = vadd.f32 %v1096_v10, %v1095_v8 }
 0x261   :  { %v1098_v12 = vrot.slane %v1097_v11, 1 }
 0x263   :  { %v1099_v13 = vadd.f32 %v1098_v12, %v1097_v11 }
 0x265   :  { %v1100_v14 = vmul.f32 0.0078125, %v1099_v13 }
 0x267   :  { %v1102_v15 = vadd.f32 1e-05, %v1100_v14 }
 0x269   :  { %3808 = vrsqrt.f32 %v1102_v15 }
 0x273   :  { %v3809_v20 = vpop.eup %3808 }
 0x274   :  { %v1104_v21 = vmul.f32 %v3809_v20, %v1101_v18 }
 0x276   :  { %v4388_v23 = vrot.slane %v1104_v21, %v4385_v19 }
 0x278   :  { %v1113_v24 = vmul.f32 %v4388_v23, %v4297_v60  ;;  %v1114_v25 = vmul.f32 %v4388_v23, %v4300_v61  ;;  %v1115_v26 = vmul.f32 %v4388_v23, %v4302_v0  ;;  %v1116_v27 = vmul.f32 %v4388_v23, %v4304_v1 }
 0x279   :  { %v1117_v28 = vmul.f32 %v4388_v23, %v4306_v2  ;;  %v1118_v29 = vmul.f32 %v4388_v23, %v4308_v3  ;;  %v1119_v60 = vmul.f32 %v4388_v23, %v4310_v4  ;;  %v1120_v61 = vmul.f32 %v4388_v23, %v4312_v49 }
 0x27a   :  { %v1121_v0 = vmul.f32 %v4388_v23, %v4314_v47  ;;  %v1122_v1 = vmul.f32 %v4388_v23, %v4316_v5  ;;  %v1123_v2 = vmul.f32 %v4388_v23, %v4318_v56  ;;  %v1124_v3 = vmul.f32 %v4388_v23, %v4320_v55 }
 0x27b   :  { %v1125_v31 = vmul.f32 %v4388_v23, %v4322_v63  ;;  %v1126_v4 = vmul.f32 %v4388_v23, %v4324_v62  ;;  %v4424_v49 = vadd.f32 %v4405_v30, %v1113_v24  ;;  %v4427_v47 = vadd.f32 %v4405_v30, %v1114_v25 }
 0x27c   :  { %v4430_v5 = vadd.f32 %v4405_v30, %v1115_v26  ;;  %v4433_v56 = vadd.f32 %v4405_v30, %v1116_v27  ;;  %v4436_v55 = vadd.f32 %v4405_v30, %v1117_v28  ;;  %v4439_v63 = vadd.f32 %v4405_v30, %v1118_v29 }
 0x27d   :  { %v4442_v62 = vadd.f32 %v4405_v30, %v1119_v60  ;;  %v3173_v32 = vmul.f32 -1.442695, %v4424_v49  ;;  %v3174_v33 = vmul.f32 -1.442695, %v4427_v47  ;;  %v4447_v34 = vadd.f32 %v4405_v30, %v1120_v61 }
 0x27e   :  { %v3175_v35 = vmul.f32 -1.442695, %v4430_v5  ;;  %v3176_v36 = vmul.f32 -1.442695, %v4433_v56  ;;  %v4452_v37 = vadd.f32 %v4405_v30, %v1121_v0  ;;  %v3177_v38 = vmul.f32 -1.442695, %v4436_v55 }
 0x27f   :  { %3810 = vpow2.f32 %v3173_v32  ;;  %v4456_v39 = vadd.f32 %v4405_v30, %v1122_v1  ;;  %v3178_v40 = vmul.f32 -1.442695, %v4439_v63  ;;  %v4460_v41 = vadd.f32 %v4405_v30, %v1123_v2 }
 0x280   :  { %3812 = vpow2.f32 %v3174_v33  ;;  %v3179_v42 = vmul.f32 -1.442695, %v4442_v62  ;;  %v4464_v43 = vadd.f32 %v4405_v30, %v1124_v3  ;;  %v3180_v44 = vmul.f32 -1.442695, %v4447_v34 }
 0x281   :  { %3814 = vpow2.f32 %v3175_v35  ;;  %v4468_v46 = vadd.f32 %v4405_v30, %v1125_v31  ;;  %v3181_v48 = vmul.f32 -1.442695, %v4452_v37  ;;  %v4472_v50 = vadd.f32 %v4405_v30, %v1126_v4 }
 0x282   :  { %3816 = vpow2.f32 %v3176_v36  ;;  %v3182_v51 = vmul.f32 -1.442695, %v4456_v39  ;;  %v3183_v52 = vmul.f32 -1.442695, %v4460_v41  ;;  %v3184_v53 = vmul.f32 -1.442695, %v4464_v43 }
 0x283   :  { %3818 = vpow2.f32 %v3177_v38  ;;  %v3185_v54 = vmul.f32 -1.442695, %v4468_v46  ;;  %v3186_v57 = vmul.f32 -1.442695, %v4472_v50  ;;  %v1111_v18 = vmul.f32 %v4388_v23, %v4291_v45 }
 0x284   :  { %3820 = vpow2.f32 %v3178_v40  ;;  %v1112_v24 = vmul.f32 %v4388_v23, %v4294_v59 }
 0x285   :  { %3822 = vpow2.f32 %v3179_v42  ;;  %v4484_v0 = vadd.f32 %v4405_v30, %v1111_v18 }
 0x286   :  { %3824 = vpow2.f32 %v3180_v44  ;;  %v4487_v2 = vadd.f32 %v4405_v30, %v1112_v24 }
 0x287   :  { %3826 = vpow2.f32 %v3181_v48  ;;  %v3171_v33 = vmul.f32 -1.442695, %v4484_v0 }
 0x288   :  { %3828 = vpow2.f32 %v3182_v51  ;;  %v3172_v36 = vmul.f32 -1.442695, %v4487_v2 }
 0x289   :  { %v3811_v58 = vpop.eup %3810  ;;  %3830 = vpow2.f32 %v3183_v52 }
 0x28a   :  { %v3813_v6 = vpop.eup %3812  ;;  %3832 = vpow2.f32 %v3184_v53  ;;  %v1200_v7 = vadd.f32 1.0, %v3811_v58 }
 0x28b   :  { %v3815_v8 = vpop.eup %3814  ;;  %3834 = vpow2.f32 %v3185_v54  ;;  %v1201_v10 = vadd.f32 1.0, %v3813_v6 }
 0x28c   :  { %v3817_v11 = vpop.eup %3816  ;;  %3836 = vpow2.f32 %v3186_v57  ;;  %v1202_v12 = vadd.f32 1.0, %v3815_v8 }
 0x28d   :  { %v3819_v13 = vpop.eup %3818  ;;  %v1203_v14 = vadd.f32 1.0, %v3817_v11  ;;  %3838 = vrcp.f32 %v1200_v7 }
 0x28e   :  { %v3821_v15 = vpop.eup %3820  ;;  %v1204_v16 = vadd.f32 1.0, %v3819_v13  ;;  %3840 = vrcp.f32 %v1201_v10 }
 0x28f   :  { %v3823_v17 = vpop.eup %3822  ;;  %v1205_v20 = vadd.f32 1.0, %v3821_v15  ;;  %3842 = vrcp.f32 %v1202_v12 }
 0x290   :  { %v3825_v21 = vpop.eup %3824  ;;  %v1206_v25 = vadd.f32 1.0, %v3823_v17  ;;  %3844 = vrcp.f32 %v1203_v14  ;;  %v3204_v17 = vld [vmem:[%s4769_s7 + $0x10] sm:$0xff] }
 0x291   :  { %v3827_v26 = vpop.eup %3826  ;;  %v1207_v27 = vadd.f32 1.0, %v3825_v21  ;;  %3846 = vrcp.f32 %v1204_v16 }
 0x292   :  { %v3829_v28 = vpop.eup %3828  ;;  %v1208_v29 = vadd.f32 1.0, %v3827_v26  ;;  %3848 = vrcp.f32 %v1205_v20 }
 0x293   :  { %v3831_v60 = vpop.eup %3830  ;;  %v1209_v61 = vadd.f32 1.0, %v3829_v28  ;;  %3850 = vrcp.f32 %v1206_v25 }
 0x294   :  { %v3833_v45 = vpop.eup %3832  ;;  %v1210_v1 = vadd.f32 1.0, %v3831_v60  ;;  %3852 = vrcp.f32 %v1207_v27 }
 0x295   :  { %v3835_v59 = vpop.eup %3834  ;;  %v1211_v23 = vadd.f32 1.0, %v3833_v45  ;;  %3854 = vrcp.f32 %v1208_v29 }
 0x296   :  { %v3837_v3 = vpop.eup %3836  ;;  %v1212_v31 = vadd.f32 1.0, %v3835_v59  ;;  %3856 = vrcp.f32 %v1209_v61 }
 0x297   :  { %v3839_v4 = vpop.eup %3838  ;;  %v1213_v32 = vadd.f32 1.0, %v3837_v3  ;;  %3858 = vrcp.f32 %v1210_v1 }
 0x298   :  { %v3841_v35 = vpop.eup %3840  ;;  %3860 = vrcp.f32 %v1211_v23  ;;  %v1248_v38 = vmul.f32 %v3839_v4, %v4424_v49 }
 0x299   :  { %v3843_v40 = vpop.eup %3842  ;;  %3862 = vrcp.f32 %v1212_v31  ;;  %v1249_v30 = vmul.f32 %v3841_v35, %v4427_v47  ;;  %v3224_v35 = vld [vmem:[%s4773_s11 + $0x18] sm:$0xff] }
 0x29a   :  { %v3845_v42 = vpop.eup %3844  ;;  %3864 = vrcp.f32 %v1213_v32  ;;  %1269 = vst.msk [vmem:[#allocation3 + $0x11] sm:$0xff] %vm991_vm4, %v1248_v38  ;;  %v1250_v44 = vmul.f32 %v3843_v40, %v4430_v5  ;;  %v1916_v38 = vld [vmem:[%s4773_s11] sm:$0xff]  ;;  %v1917_v40 = vld [vmem:[%s4773_s11 + $0x8] sm:$0xff] }
 0x29b   :  { %v3847_v48 = vpop.eup %3846  ;;  %v1251_v51 = vmul.f32 %v3845_v42, %v4433_v56  ;;  %1270 = vst.msk [vmem:[#allocation3 + $0x19] sm:$0xff] %vm991_vm4, %v1249_v30  ;;  %3866 = vpow2.f32 %v3171_v33  ;;  %v3223_v33 = vld [vmem:[%s4773_s11 + $0x10] sm:$0xff]  ;;  %v3213_v30 = vld [vmem:[%s4770_s8] ss:$0 sm:$0xff]  ;;  %v4572_v42 = vpack.c.bf16 %v1917_v40, %v1916_v38 }
 0x29c   :  { %v3849_v52 = vpop.eup %3848  ;;  %v1252_v53 = vmul.f32 %v3847_v48, %v4436_v55  ;;  %3868 = vpow2.f32 %v3172_v36  ;;  %1271 = vst.msk [vmem:[#allocation3 + $0x21] sm:$0xff] %vm991_vm4, %v1250_v44  ;;  %v3698_v36 = vpack.c.bf16 %v3224_v35, %v3223_v33  ;;  %v2350_v33 = vld [vmem:[%s4775_s13] sm:$0xff]  ;;  %v2351_v35 = vld [vmem:[%s4775_s13 + $0x8] sm:$0xff] }
 0x29d   :  { %v3851_v49 = vpop.eup %3850  ;;  %v1253_v47 = vmul.f32 %v3849_v52, %v4439_v63  ;;  %1272 = vst.msk [vmem:[#allocation3 + $0x29] sm:$0xff] %vm991_vm4, %v1251_v51 }
 0x29e   :  { %v3853_v54 = vpop.eup %3852  ;;  %v1254_v5 = vmul.f32 %v3851_v49, %v4442_v62  ;;  %1273 = vst.msk [vmem:[#allocation3 + $0x31] sm:$0xff] %vm991_vm4, %v1252_v53 }
 0x29f   :  { %v3855_v56 = vpop.eup %3854  ;;  %v1255_v57 = vmul.f32 %v3853_v54, %v4447_v34  ;;  %1274 = vst.msk [vmem:[#allocation3 + $0x39] sm:$0xff] %vm991_vm4, %v1253_v47 }
 0x2a0   :  { %v3857_v58 = vpop.eup %3856  ;;  %v1256_v55 = vmul.f32 %v3855_v56, %v4452_v37  ;;  %1275 = vst.msk [vmem:[#allocation3 + $0x49] sm:$0xff] %vm991_vm4, %v1254_v5 }
 0x2a1   :  { %v3859_v6 = vpop.eup %3858  ;;  %v1257_v63 = vmul.f32 %v3857_v58, %v4456_v39  ;;  %1276 = vst.msk [vmem:[#allocation3 + $0x51] sm:$0xff] %vm991_vm4, %v1255_v57 }
 0x2a2   :  { %v3861_v7 = vpop.eup %3860  ;;  %v1258_v62 = vmul.f32 %v3859_v6, %v4460_v41  ;;  %1277 = vst.msk [vmem:[#allocation3 + $0x59] sm:$0xff] %vm991_vm4, %v1256_v55 }
 0x2a3   :  { %v3863_v8 = vpop.eup %3862  ;;  %v1259_v34 = vmul.f32 %v3861_v7, %v4464_v43  ;;  %1278 = vst.msk [vmem:[#allocation3 + $0x61] sm:$0xff] %vm991_vm4, %v1257_v63 }
 0x2a4   :  { %v3865_v10 = vpop.eup %3864  ;;  %v1260_v37 = vmul.f32 %v3863_v8, %v4468_v46  ;;  %1279 = vst.msk [vmem:[#allocation3 + $0x69] sm:$0xff] %vm991_vm4, %v1258_v62  ;;  %v1304_v18 = vld [vmem:[#allocation3 + $0x21] ss:$2 sm:$0xff]  ;;  %v1287_v28 = vld [vmem:[#allocation3 + $0x20] ss:$2 sm:$0xff] }
 0x2a5   :  { %v3867_v11 = vpop.eup %3866  ;;  %v1261_v39 = vmul.f32 %v3865_v10, %v4472_v50  ;;  %1280 = vst.msk [vmem:[#allocation3 + $0x71] sm:$0xff] %vm991_vm4, %v1259_v34  ;;  %v1302_v50 = vld [vmem:[#allocation3 + $0x11] ss:$2 sm:$0xff]  ;;  %v1580_v59 = vld [vmem:[#allocation3 + $0x22] ss:$2 sm:$0xff] }
 0x2a6   :  { %v3869_v12 = vpop.eup %3868  ;;  %1281 = vst.msk [vmem:[#allocation3 + $0x79] sm:$0xff] %vm991_vm4, %v1260_v37  ;;  %v1198_v41 = vadd.f32 1.0, %v3867_v11  ;;  %v1306_v20 = vld [vmem:[#allocation3 + $0x31] ss:$2 sm:$0xff]  ;;  %v1289_v29 = vld [vmem:[#allocation3 + $0x30] ss:$2 sm:$0xff] }
 0x2a7   :  { %1282 = vst.msk [vmem:[#allocation3 + $0x81] sm:$0xff] %vm991_vm4, %v1261_v39  ;;  %v1199_v13 = vadd.f32 1.0, %v3869_v12  ;;  %v1582_v23 = vld [vmem:[#allocation3 + $0x32] ss:$2 sm:$0xff] }
 0x2a8   :  { %3870 = vrcp.f32 %v1198_v41  ;;  %v1308_v21 = vld [vmem:[#allocation3 + $0x49] ss:$2 sm:$0xff]  ;;  %v1291_v60 = vld [vmem:[#allocation3 + $0x48] ss:$2 sm:$0xff] }
 0x2a9   :  { %3872 = vrcp.f32 %v1199_v13  ;;  %v1584_v3 = vld [vmem:[#allocation3 + $0x4a] ss:$2 sm:$0xff] }
 0x2aa   :  { %v1310_v24 = vld [vmem:[#allocation3 + $0x59] ss:$2 sm:$0xff]  ;;  %v1293_v61 = vld [vmem:[#allocation3 + $0x58] ss:$2 sm:$0xff] }
 0x2ab   :  { %v1586_v31 = vld [vmem:[#allocation3 + $0x5a] ss:$2 sm:$0xff] }
 0x2ac   :  { %v1312_v25 = vld [vmem:[#allocation3 + $0x69] ss:$2 sm:$0xff]  ;;  %v1588_v4 = vld [vmem:[#allocation3 + $0x6a] ss:$2 sm:$0xff] }
 0x2ae   :  { %v1314_v26 = vld [vmem:[#allocation3 + $0x79] ss:$2 sm:$0xff]  ;;  %v1297_v45 = vld [vmem:[#allocation3 + $0x78] ss:$2 sm:$0xff] }
 0x2af   :  { %v1590_v32 = vld [vmem:[#allocation3 + $0x7a] ss:$2 sm:$0xff] }
 0x2b2   :  { %v3871_v43 = vpop.eup %3870 }
 0x2b3   :  { %v3873_v14 = vpop.eup %3872  ;;  %v1246_v46 = vmul.f32 %v3871_v43, %v4484_v0  ;;  %v1295_v0 = vld [vmem:[#allocation3 + $0x68] ss:$2 sm:$0xff] }
 0x2b4   :  { %v1247_v15 = vmul.f32 %v3873_v14, %v4487_v2  ;;  %v1578_v2 = vld [vmem:[#allocation3 + $0x12] ss:$2 sm:$0xff] }
 0x2b5   :  { %1267 = vst.msk [vmem:[#allocation3 + $0x1] sm:$0xff] %vm991_vm4, %v1246_v46 }
 0x2b6   :  { %1268 = vst.msk [vmem:[#allocation3 + $0x9] sm:$0xff] %vm991_vm4, %v1247_v15 }
 0x2bd   :  { %v1300_v16 = vld [vmem:[#allocation3 + $0x1] ss:$2 sm:$0xff]  ;;  %v1283_v27 = vld [vmem:[#allocation3] ss:$2 sm:$0xff] }
 0x2be   :  { %3556 = vmatprep.mubr.msk.f32.mxu1 %vm991_vm4, %v1300_v16  ;;  %v1576_v1 = vld [vmem:[#allocation3 + $0x2] ss:$2 sm:$0xff] }
 0x2bf   :  { %3557 = vmatmul.mubr.msk.f32.vlgmr.msra.gmra.mrb[18].mxu1 %vm991_vm4, %v1302_v50 }
 0x2c0   :  { %3569 = vmatpush3.msra.mxu1 %v4350_v22  ;;  %3559 = vmatprep.mubr.msk.f32.mxu1 %vm991_vm4, %v1304_v18  ;;  %v1285_v22 = vld [vmem:[#allocation3 + $0x10] ss:$2 sm:$0xff] }
 0x2c1   :  { %3582 = vmatprep.subr.mxu1 %v3204_v17 }
 0x2c3   :  { %3560 = vmatmul.mubr.msk.f32.gmra.mrb[20].mxu1 %vm991_vm4, %v1306_v20 }
 0x2c4   :  { %3562 = vmatprep.mubr.msk.f32.mxu1 %vm991_vm4, %v1308_v21 }
 0x2c7   :  { %3563 = vmatmul.mubr.msk.f32.gmra.mrb[22].mxu1 %vm991_vm4, %v1310_v24 }
 0x2c8   :  { %3565 = vmatprep.mubr.msk.f32.mxu1 %vm991_vm4, %v1312_v25 }
 0x2cb   :  { %3566 = vmatmul.mubr.msk.f32.gmra.mrb[24].mxu1 %vm991_vm4, %v1314_v26 }
 0x2cc   :  { %3570 = vmatprep.mubr.msk.f32.mxu1 %vm991_vm4, %v1283_v27 }
 0x2cf   :  { %3571 = vmatmul.mubr.msk.f32.vlgmr.msra.gmra.mrb[18].mxu1 %vm991_vm4, %v1285_v22 }
 0x2d0   :  { %3583 = vmatpush3.msra.mxu1 %v3204_v17  ;;  %3573 = vmatprep.mubr.msk.f32.mxu1 %vm991_vm4, %v1287_v28 }
 0x2d1   :  { %3699 = vmatprep.subr.bf16.mxu1 %v3698_v36 }
 0x2d3   :  { %3574 = vmatmul.mubr.msk.f32.gmra.mrb[20].mxu1 %vm991_vm4, %v1289_v29 }
 0x2d4   :  { %3576 = vmatprep.mubr.msk.f32.mxu1 %vm991_vm4, %v1291_v60 }
 0x2d7   :  { %3577 = vmatmul.mubr.msk.f32.gmra.mrb[22].mxu1 %vm991_vm4, %v1293_v61 }
 0x2d8   :  { %3579 = vmatprep.mubr.msk.f32.mxu1 %vm991_vm4, %v1295_v0 }
 0x2db   :  { %3580 = vmatmul.mubr.msk.f32.gmra.mrb[24].mxu1 %vm991_vm4, %v1297_v45 }
 0x2dc   :  { %3584 = vmatprep.mubr.msk.f32.mxu1 %vm991_vm4, %v1576_v1 }
 0x2df   :  { %3585 = vmatmul.mubr.msk.f32.vlgmr.msra.gmra.mrb[18].mxu1 %vm991_vm4, %v1578_v2 }
 0x2e0   :  { %3587 = vmatprep.mubr.msk.f32.mxu1 %vm991_vm4, %v1580_v59  ;;  %3701 = vmatpush3.bf16.msra.mxu1 %v3698_v36  ;;  %v2352_v36 = vld [vmem:[%s4775_s13 + $0x10] sm:$0xff] }
 0x2e1   :  { %3703 = vmatprep.subr.bf16.mxu1 %v4572_v42 }
 0x2e3   :  { %3588 = vmatmul.mubr.msk.f32.gmra.mrb[20].mxu1 %vm991_vm4, %v1582_v23 }
 0x2e4   :  { %3590 = vmatprep.mubr.msk.f32.mxu1 %vm991_vm4, %v1584_v3 }
 0x2e7   :  { %3591 = vmatmul.mubr.msk.f32.gmra.mrb[22].mxu1 %vm991_vm4, %v1586_v31 }
 0x2e8   :  { %3593 = vmatprep.mubr.msk.f32.mxu1 %vm991_vm4, %v1588_v4 }
 0x2eb   :  { %3594 = vmatmul.mubr.msk.f32.gmra.mrb[24].mxu1 %vm991_vm4, %v1590_v32 }
 0x3b2   :  { %v3586_v44 = vpop.f32.mrb[18].mxu1 }
 0x3b3   :  { %v1738_v48 = vadd.f32 %v3586_v44, %v3213_v30  ;;  %v1683_v9 = vpop.f32.mrb[19].mxu1  ;;  %v2353_v44 = vld [vmem:[%s4775_s13 + $0x18] sm:$0xff] }
 0x3b4   :  { %v1737_v51 = vadd.f32 %v3213_v30, %v1683_v9  ;;  %v3714_v9 = vpack.c.bf16 %v2353_v44, %v2352_v36 }
 0x3b5   :  { %v1746_v52 = vsel %vm797_vm3, %v1738_v48, 0.0 }
 0x3b6   :  { %v1745_v53 = vsel %vm797_vm3, %v1737_v51, 0.0  ;;  %v3589_v49 = vpop.f32.mrb[20].mxu1 }
 0x3b7   :  { %v1747_v47 = vadd.f32 %v1746_v52, %v1745_v53  ;;  %v1693_v54 = vpop.f32.mrb[21].mxu1  ;;  %v1740_v5 = vadd.f32 %v3589_v49, %v3213_v30 }
 0x3b8   :  { %v1739_v56 = vadd.f32 %v3213_v30, %v1693_v54 }
 0x3b9   :  { %v1750_v63 = vsel %vm797_vm3, %v1740_v5, 0.0 }
 0x3ba   :  { %v1748_v57 = vsel %vm797_vm3, %v1739_v56, 0.0  ;;  %v3592_v58 = vpop.f32.mrb[22].mxu1 }
 0x3bb   :  { %v1749_v55 = vadd.f32 %v1748_v57, %v1747_v47  ;;  %v1703_v6 = vpop.f32.mrb[23].mxu1  ;;  %v1742_v7 = vadd.f32 %v3592_v58, %v3213_v30 }
 0x3bc   :  { %v1741_v62 = vadd.f32 %v3213_v30, %v1703_v6 }
 0x3bd   :  { %v1751_v8 = vadd.f32 %v1750_v63, %v1749_v55  ;;  %v1754_v39 = vsel %vm797_vm3, %v1742_v7, 0.0 }
 0x3be   :  { %v1752_v34 = vsel %vm797_vm3, %v1741_v62, 0.0  ;;  %v3595_v10 = vpop.f32.mrb[24].mxu1 }
 0x3bf   :  { %v1753_v37 = vadd.f32 %v1752_v34, %v1751_v8  ;;  %v1713_v11 = vpop.f32.mrb[25].mxu1  ;;  %v1744_v12 = vadd.f32 %v3595_v10, %v3213_v30 }
 0x3c0   :  { %v1743_v41 = vadd.f32 %v3213_v30, %v1713_v11  ;;  %v3710_v30 = vpack.c.bf16 %v2351_v35, %v2350_v33 }
 0x3c1   :  { %v1755_v13 = vadd.f32 %v1754_v39, %v1753_v37  ;;  %v1758_v46 = vsel %vm797_vm3, %v1744_v12, 0.0  ;;  %v1806_v37 = vld [vmem:[%s4771_s9] sm:$0x1] }
 0x3c2   :  { %v1756_v43 = vsel %vm797_vm3, %v1743_v41, 0.0  ;;  %3711 = vmatprep.subr.bf16.mxu0 %v3710_v30 }
 0x3c3   :  { %v1757_v14 = vadd.f32 %v1756_v43, %v1755_v13  ;;  %3713 = vmatpush3.bf16.msra.mxu0 %v3710_v30 }
 0x3c4   :  { %3715 = vmatprep.subr.bf16.mxu0 %v3714_v9 }
 0x3c5   :  { %v1759_v15 = vadd.f32 %v1758_v46, %v1757_v14 }
 0x3c7   :  { %v1760_v50 = vrot.slane %v1759_v15, 4  ;;  %3717 = vmatpush3.bf16.msra.mxu0 %v3714_v9 }
 0x3c9   :  { %v1761_v16 = vadd.f32 %v1760_v50, %v1759_v15 }
 0x3cb   :  { %v1762_v17 = vrot.slane %v1761_v16, 2 }
 0x3cd   :  { %v1763_v18 = vadd.f32 %v1762_v17, %v1761_v16 }
 0x3cf   :  { %v1764_v20 = vrot.slane %v1763_v18, 1 }
 0x3d1   :  { %v1765_v21 = vadd.f32 %v1764_v20, %v1763_v18 }
 0x3d3   :  { %v1767_v24 = vmul.f32 0.015625, %v1765_v21 }
 0x3d5   :  { %v1768_v25 = vsub.f32 %v1737_v51, %v1767_v24  ;;  %v1769_v26 = vsub.f32 %v1738_v48, %v1767_v24  ;;  %v1770_v27 = vsub.f32 %v1739_v56, %v1767_v24  ;;  %v1771_v22 = vsub.f32 %v1740_v5, %v1767_v24 }
 0x3d6   :  { %v1772_v28 = vsub.f32 %v1741_v62, %v1767_v24  ;;  %v1773_v29 = vsub.f32 %v1742_v7, %v1767_v24  ;;  %v1774_v60 = vsub.f32 %v1743_v41, %v1767_v24  ;;  %v1775_v61 = vsub.f32 %v1744_v12, %v1767_v24  ;;  %v3214_v41 = vld [vmem:[%s4772_s10] ss:$0 sm:$0xff] }
 0x3d7   :  { %v1776_v0 = vmul.f32 %v1768_v25, %v1768_v25  ;;  %v1777_v45 = vmul.f32 %v1769_v26, %v1769_v26  ;;  %v1778_v1 = vmul.f32 %v1770_v27, %v1770_v27  ;;  %v1779_v2 = vmul.f32 %v1771_v22, %v1771_v22 }
 0x3d8   :  { %v1780_v31 = vmul.f32 %v1772_v28, %v1772_v28  ;;  %v1781_v38 = vmul.f32 %v1773_v29, %v1773_v29  ;;  %v1782_v51 = vmul.f32 %v1774_v60, %v1774_v60  ;;  %v1783_v49 = vmul.f32 %v1775_v61, %v1775_v61 }
 0x3d9   :  { %v1784_v59 = vsel %vm797_vm3, %v1776_v0, 0.0  ;;  %v1785_v23 = vsel %vm797_vm3, %v1777_v45, 0.0  ;;  %v1787_v4 = vsel %vm797_vm3, %v1778_v1, 0.0  ;;  %v1789_v40 = vsel %vm797_vm3, %v1779_v2, 0.0 }
 0x3da   :  { %v1786_v3 = vadd.f32 %v1785_v23, %v1784_v59  ;;  %v1791_v52 = vsel %vm797_vm3, %v1780_v31, 0.0  ;;  %v1793_v47 = vsel %vm797_vm3, %v1781_v38, 0.0  ;;  %v1795_v5 = vsel %vm797_vm3, %v1782_v51, 0.0 }
 0x3db   :  { %v1797_v57 = vsel %vm797_vm3, %v1783_v49, 0.0 }
 0x3dc   :  { %v1788_v32 = vadd.f32 %v1787_v4, %v1786_v3 }
 0x3de   :  { %v1790_v48 = vadd.f32 %v1789_v40, %v1788_v32 }
 0x3e0   :  { %v1792_v53 = vadd.f32 %v1791_v52, %v1790_v48 }
 0x3e2   :  { %v1794_v54 = vadd.f32 %v1793_v47, %v1792_v53 }
 0x3e4   :  { %v1796_v56 = vadd.f32 %v1795_v5, %v1794_v54 }
 0x3e6   :  { %v1798_v58 = vadd.f32 %v1797_v57, %v1796_v56 }
 0x3e8   :  { %v1799_v55 = vrot.slane %v1798_v58, 4 }
 0x3ea   :  { %v1800_v6 = vadd.f32 %v1799_v55, %v1798_v58 }
 0x3ec   :  { %v1801_v63 = vrot.slane %v1800_v6, 2 }
 0x3ee   :  { %v1802_v7 = vadd.f32 %v1801_v63, %v1800_v6 }
 0x3f0   :  { %v1803_v62 = vrot.slane %v1802_v7, 1 }
 0x3f2   :  { %v1804_v8 = vadd.f32 %v1803_v62, %v1802_v7 }
 0x3f4   :  { %v1805_v34 = vmul.f32 0.015625, %v1804_v8 }
 0x3f6   :  { %v1807_v10 = vadd.f32 1e-05, %v1805_v34  ;;  %v3241_v34 = vld [vmem:[%s4773_s11 + $0x20] sm:$0xff] }
 0x3f8   :  { %3874 = vrsqrt.f32 %v1807_v10  ;;  %v3242_v10 = vld [vmem:[%s4773_s11 + $0x28] sm:$0xff] }
 0x402   :  { %v3875_v11 = vpop.eup %3874 }
 0x403   :  { %v1809_v39 = vmul.f32 %v3875_v11, %v1806_v37 }
 0x405   :  { %v1814_v12 = vrot.slane %v1809_v39, %v4385_v19  ;;  %v3706_v39 = vpack.c.bf16 %v3242_v10, %v3241_v34 }
 0x407   :  { %v1816_v13 = vmul.f32 %v1814_v12, %v1768_v25  ;;  %v1817_v43 = vmul.f32 %v1814_v12, %v1769_v26  ;;  %v1818_v14 = vmul.f32 %v1814_v12, %v1770_v27  ;;  %v1819_v46 = vmul.f32 %v1814_v12, %v1771_v22 }
 0x408   :  { %v1820_v15 = vmul.f32 %v1814_v12, %v1772_v28  ;;  %v1821_v50 = vmul.f32 %v1814_v12, %v1773_v29  ;;  %v1822_v16 = vmul.f32 %v1814_v12, %v1774_v60  ;;  %v1823_v17 = vmul.f32 %v1814_v12, %v1775_v61 }
 0x409   :  { %v1831_v18 = vadd.f32 %v3214_v41, %v1816_v13  ;;  %v1832_v20 = vadd.f32 %v3214_v41, %v1817_v43  ;;  %v1833_v21 = vadd.f32 %v3214_v41, %v1818_v14  ;;  %v1834_v24 = vadd.f32 %v3214_v41, %v1819_v46 }
 0x40a   :  { %v1835_v0 = vadd.f32 %v3214_v41, %v1820_v15  ;;  %v1836_v45 = vadd.f32 %v3214_v41, %v1821_v50  ;;  %v1837_v1 = vadd.f32 %v3214_v41, %v1822_v16  ;;  %v1838_v3 = vadd.f32 %v3214_v41, %v1823_v17 }
 0x40b   :  { %v3215_v2 = vmul.f32 -1.442695, %v1831_v18  ;;  %v3216_v59 = vmul.f32 -1.442695, %v1832_v20  ;;  %v3217_v23 = vmul.f32 -1.442695, %v1833_v21 }
 0x40c   :  { %v3218_v31 = vmul.f32 -1.442695, %v1834_v24  ;;  %v3219_v25 = vmul.f32 -1.442695, %v1835_v0  ;;  %v3220_v26 = vmul.f32 -1.442695, %v1836_v45 }
 0x40d   :  { %3876 = vpow2.f32 %v3215_v2  ;;  %v3221_v27 = vmul.f32 -1.442695, %v1837_v1  ;;  %v3222_v22 = vmul.f32 -1.442695, %v1838_v3 }
 0x40e   :  { %3878 = vpow2.f32 %v3216_v59 }
 0x40f   :  { %3880 = vpow2.f32 %v3217_v23 }
 0x410   :  { %3882 = vpow2.f32 %v3218_v31 }
 0x411   :  { %3884 = vpow2.f32 %v3219_v25  ;;  %v3251_v25 = vld [vmem:[%s4774_s12] ss:$0 sm:$0xff] }
 0x412   :  { %3886 = vpow2.f32 %v3220_v26 }
 0x413   :  { %3888 = vpow2.f32 %v3221_v27 }
 0x414   :  { %3890 = vpow2.f32 %v3222_v22 }
 0x417   :  { %v3877_v28 = vpop.eup %3876 }
 0x418   :  { %v3879_v29 = vpop.eup %3878  ;;  %v1863_v60 = vadd.f32 1.0, %v3877_v28 }
 0x419   :  { %v3881_v61 = vpop.eup %3880  ;;  %v1864_v4 = vadd.f32 1.0, %v3879_v29 }
 0x41a   :  { %v3883_v32 = vpop.eup %3882  ;;  %v1865_v33 = vadd.f32 1.0, %v3881_v61  ;;  %3892 = vrcp.f32 %v1863_v60 }
 0x41b   :  { %v3885_v35 = vpop.eup %3884  ;;  %v1866_v36 = vadd.f32 1.0, %v3883_v32  ;;  %3894 = vrcp.f32 %v1864_v4 }
 0x41c   :  { %v3887_v38 = vpop.eup %3886  ;;  %v1867_v40 = vadd.f32 1.0, %v3885_v35  ;;  %3896 = vrcp.f32 %v1865_v33 }
 0x41d   :  { %v3889_v30 = vpop.eup %3888  ;;  %v1868_v44 = vadd.f32 1.0, %v3887_v38  ;;  %3898 = vrcp.f32 %v1866_v36 }
 0x41e   :  { %v3891_v48 = vpop.eup %3890  ;;  %v1869_v9 = vadd.f32 1.0, %v3889_v30  ;;  %3900 = vrcp.f32 %v1867_v40 }
 0x41f   :  { %v1870_v51 = vadd.f32 1.0, %v3891_v48  ;;  %3902 = vrcp.f32 %v1868_v44  ;;  %v3270_v48 = vld [vmem:[%s4779_s17 + $0x10] sm:$0xff] }
 0x420   :  { %3904 = vrcp.f32 %v1869_v9  ;;  %v3271_v9 = vld [vmem:[%s4779_s17 + $0x18] sm:$0xff] }
 0x421   :  { %3906 = vrcp.f32 %v1870_v51  ;;  %v3718_v51 = vpack.c.bf16 %v3271_v9, %v3270_v48 }
 0x423   :  { %3719 = vmatprep.subr.bf16.mxu0 %v3718_v51 }
 0x424   :  { %v3893_v52 = vpop.eup %3892 }
 0x425   :  { %v3895_v53 = vpop.eup %3894  ;;  %v1887_v49 = vmul.f32 %v3893_v52, %v1831_v18  ;;  %v3252_v52 = vld [vmem:[%s4776_s14] ss:$0 sm:$0xff] }
 0x426   :  { %v3897_v47 = vpop.eup %3896  ;;  %v1888_v54 = vmul.f32 %v3895_v53, %v1832_v20  ;;  %v2659_v53 = vld [vmem:[%s4779_s17] sm:$0xff] }
 0x427   :  { %v3899_v5 = vpop.eup %3898  ;;  %v1889_v56 = vmul.f32 %v3897_v47, %v1833_v21  ;;  %1900 = vst.msk [vmem:[#allocation4 + $0x1] sm:$0xff] %vm797_vm3, %v1887_v49  ;;  %v2660_v49 = vld [vmem:[%s4779_s17 + $0x8] sm:$0xff] }
 0x428   :  { %v3901_v57 = vpop.eup %3900  ;;  %v1890_v58 = vmul.f32 %v3899_v5, %v1834_v24  ;;  %1901 = vst.msk [vmem:[#allocation4 + $0x9] sm:$0xff] %vm797_vm3, %v1888_v54  ;;  %v4675_v47 = vpack.c.bf16 %v2660_v49, %v2659_v53 }
 0x429   :  { %v3903_v55 = vpop.eup %3902  ;;  %v1891_v6 = vmul.f32 %v3901_v57, %v1835_v0  ;;  %1902 = vst.msk [vmem:[#allocation4 + $0x11] sm:$0xff] %vm797_vm3, %v1889_v56 }
 0x42a   :  { %v3905_v63 = vpop.eup %3904  ;;  %v1892_v7 = vmul.f32 %v3903_v55, %v1836_v45  ;;  %1903 = vst.msk [vmem:[#allocation4 + $0x19] sm:$0xff] %vm797_vm3, %v1890_v58 }
 0x42b   :  { %v3907_v62 = vpop.eup %3906  ;;  %v1893_v8 = vmul.f32 %v3905_v63, %v1837_v1  ;;  %1904 = vst.msk [vmem:[#allocation4 + $0x29] sm:$0xff] %vm797_vm3, %v1891_v6 }
 0x42c   :  { %v1894_v37 = vmul.f32 %v3907_v62, %v1838_v3  ;;  %1905 = vst.msk [vmem:[#allocation4 + $0x31] sm:$0xff] %vm797_vm3, %v1892_v7 }
 0x42d   :  { %1906 = vst.msk [vmem:[#allocation4 + $0x39] sm:$0xff] %vm797_vm3, %v1893_v8 }
 0x42e   :  { %1907 = vst.msk [vmem:[#allocation4 + $0x41] sm:$0xff] %vm797_vm3, %v1894_v37  ;;  %v1918_v11 = vld [vmem:[#allocation4 + $0x1] sm:$0xff] }
 0x42f   :  { %3600 = vmatprep.mubr.msk.f32.mxu1 %vm797_vm3, %v1918_v11  ;;  %v1919_v12 = vld [vmem:[#allocation4 + $0x9] sm:$0xff]  ;;  %v1908_v50 = vld [vmem:[#allocation4] sm:$0xff] }
 0x430   :  { %3601 = vmatmul.mubr.msk.f32.vlgmr.msra.gmra.mrb[26].mxu1 %vm797_vm3, %v1919_v12  ;;  %v1920_v41 = vld [vmem:[#allocation4 + $0x11] sm:$0xff]  ;;  %v2187_v0 = vld [vmem:[#allocation4 + $0x2] sm:$0xff] }
 0x431   :  { %3705 = vmatpush3.bf16.msra.mxu1 %v4572_v42  ;;  %3603 = vmatprep.mubr.msk.f32.mxu1 %vm797_vm3, %v1920_v41  ;;  %v1921_v13 = vld [vmem:[#allocation4 + $0x19] sm:$0xff]  ;;  %v1909_v42 = vld [vmem:[#allocation4 + $0x8] sm:$0xff]  ;;  %v1910_v16 = vld [vmem:[#allocation4 + $0x10] sm:$0xff] }
 0x432   :  { %3707 = vmatprep.subr.bf16.mxu1 %v3706_v39  ;;  %v1922_v43 = vld [vmem:[#allocation4 + $0x29] sm:$0xff]  ;;  %v1911_v17 = vld [vmem:[#allocation4 + $0x18] sm:$0xff] }
 0x433   :  { %v1923_v14 = vld [vmem:[#allocation4 + $0x31] sm:$0xff]  ;;  %v1912_v18 = vld [vmem:[#allocation4 + $0x28] sm:$0xff]  ;;  %v2190_v2 = vld [vmem:[#allocation4 + $0x1a] sm:$0xff] }
 0x434   :  { %3604 = vmatmul.mubr.msk.f32.gmra.mrb[28].mxu1 %vm797_vm3, %v1921_v13  ;;  %v1924_v46 = vld [vmem:[#allocation4 + $0x39] sm:$0xff]  ;;  %v1913_v20 = vld [vmem:[#allocation4 + $0x30] sm:$0xff] }
 0x435   :  { %3606 = vmatprep.mubr.msk.f32.mxu1 %vm797_vm3, %v1922_v43  ;;  %v1925_v15 = vld [vmem:[#allocation4 + $0x41] sm:$0xff]  ;;  %v1914_v21 = vld [vmem:[#allocation4 + $0x38] sm:$0xff]  ;;  %v2188_v45 = vld [vmem:[#allocation4 + $0xa] sm:$0xff] }
 0x436   :  { %v1915_v24 = vld [vmem:[#allocation4 + $0x40] sm:$0xff]  ;;  %v2189_v1 = vld [vmem:[#allocation4 + $0x12] sm:$0xff]  ;;  %v2191_v59 = vld [vmem:[#allocation4 + $0x2a] sm:$0xff] }
 0x437   :  { %v2192_v23 = vld [vmem:[#allocation4 + $0x32] sm:$0xff]  ;;  %v2193_v3 = vld [vmem:[#allocation4 + $0x3a] sm:$0xff]  ;;  %v2194_v31 = vld [vmem:[#allocation4 + $0x42] sm:$0xff] }
 0x438   :  { %3607 = vmatmul.mubr.msk.f32.gmra.mrb[30].mxu1 %vm797_vm3, %v1923_v14 }
 0x439   :  { %3609 = vmatprep.mubr.msk.f32.mxu1 %vm797_vm3, %v1924_v46 }
 0x43c   :  { %3610 = vmatmul.mubr.msk.f32.gmra.mrb[32].mxu1 %vm797_vm3, %v1925_v15 }
 0x43d   :  { %3616 = vmatprep.mubr.msk.f32.mxu1 %vm797_vm3, %v1908_v50 }
 0x440   :  { %3617 = vmatmul.mubr.msk.f32.vlgmr.msra.gmra.mrb[26].mxu1 %vm797_vm3, %v1909_v42 }
 0x441   :  { %3709 = vmatpush3.bf16.msra.mxu1 %v3706_v39  ;;  %3619 = vmatprep.mubr.msk.f32.mxu1 %vm797_vm3, %v1910_v16 }
 0x444   :  { %3620 = vmatmul.mubr.msk.f32.gmra.mrb[28].mxu1 %vm797_vm3, %v1911_v17 }
 0x445   :  { %3622 = vmatprep.mubr.msk.f32.mxu1 %vm797_vm3, %v1912_v18 }
 0x448   :  { %3623 = vmatmul.mubr.msk.f32.gmra.mrb[30].mxu1 %vm797_vm3, %v1913_v20 }
 0x449   :  { %3625 = vmatprep.mubr.msk.f32.mxu1 %vm797_vm3, %v1914_v21 }
 0x44c   :  { %3626 = vmatmul.mubr.msk.f32.gmra.mrb[32].mxu1 %vm797_vm3, %v1915_v24 }
 0x44d   :  { %3632 = vmatprep.mubr.msk.f32.mxu1 %vm797_vm3, %v2187_v0 }
 0x450   :  { %3633 = vmatmul.mubr.msk.f32.vlgmr.msra.gmra.mrb[26].mxu1 %vm797_vm3, %v2188_v45 }
 0x451   :  { %3635 = vmatprep.mubr.msk.f32.mxu1 %vm797_vm3, %v2189_v1 }
 0x454   :  { %3636 = vmatmul.mubr.msk.f32.gmra.mrb[28].mxu1 %vm797_vm3, %v2190_v2 }
 0x455   :  { %3638 = vmatprep.mubr.msk.f32.mxu1 %vm797_vm3, %v2191_v59 }
 0x458   :  { %3639 = vmatmul.mubr.msk.f32.gmra.mrb[30].mxu1 %vm797_vm3, %v2192_v23 }
 0x459   :  { %3641 = vmatprep.mubr.msk.f32.mxu1 %vm797_vm3, %v2193_v3 }
 0x45c   :  { %3642 = vmatmul.mubr.msk.f32.gmra.mrb[32].mxu1 %vm797_vm3, %v2194_v31 }
 0x523   :  { %v3634_v26 = vpop.f32.mrb[26].mxu1 }
 0x524   :  { %v2288_v27 = vpop.f32.mrb[27].mxu1  ;;  %v2343_v28 = vadd.f32 %v3634_v26, %v3251_v25 }
 0x525   :  { %v2342_v22 = vadd.f32 %v3251_v25, %v2288_v27 }
 0x527   :  { %v3637_v29 = vpop.f32.mrb[28].mxu1  ;;  %3652 = vmatprep.mubr.msk.f32.mxu0 %vm2361_vm7, %v2342_v22 }
 0x528   :  { %v2298_v60 = vpop.f32.mrb[29].mxu1  ;;  %3653 = vmatmul.mubr.msk.f32.vlgmr.msra.gmra.mrb[16].mxu0 %vm2361_vm7, %v2343_v28  ;;  %v2345_v4 = vadd.f32 %v3637_v29, %v3251_v25 }
 0x529   :  { %v2344_v61 = vadd.f32 %v3251_v25, %v2298_v60  ;;  %3721 = vmatpush3.bf16.msra.mxu0 %v3718_v51 }
 0x52a   :  { %3723 = vmatprep.subr.bf16.mxu0 %v4675_v47 }
 0x52b   :  { %v3640_v32 = vpop.f32.mrb[30].mxu1  ;;  %3655 = vmatprep.mubr.msk.f32.mxu0 %vm2361_vm7, %v2344_v61 }
 0x52c   :  { %v2308_v33 = vpop.f32.mrb[31].mxu1  ;;  %3656 = vmatmul.mubr.msk.f32.gmra.mrb[18].mxu0 %vm2361_vm7, %v2345_v4  ;;  %v2347_v36 = vadd.f32 %v3640_v32, %v3251_v25 }
 0x52d   :  { %v2346_v35 = vadd.f32 %v3251_v25, %v2308_v33 }
 0x52f   :  { %v3643_v38 = vpop.f32.mrb[32].mxu1  ;;  %3658 = vmatprep.mubr.msk.f32.mxu0 %vm2361_vm7, %v2346_v35 }
 0x530   :  { %v2318_v40 = vpop.f32.mrb[33].mxu1  ;;  %3659 = vmatmul.mubr.msk.f32.gmra.mrb[20].mxu0 %vm2361_vm7, %v2347_v36  ;;  %v2349_v44 = vadd.f32 %v3643_v38, %v3251_v25 }
 0x531   :  { %v2348_v30 = vadd.f32 %v3251_v25, %v2318_v40 }
 0x533   :  { %3661 = vmatprep.mubr.msk.f32.mxu0 %vm2361_vm7, %v2348_v30 }
 0x534   :  { %3662 = vmatmul.mubr.msk.f32.gmra.mrb[22].mxu0 %vm2361_vm7, %v2349_v44 }
 0x5fb   :  { %v3654_v54 = vpop.f32.mrb[16].mxu0 }
 0x5fc   :  { %v2458_v5 = vadd.f32 %v3654_v54, %v3252_v52  ;;  %v2452_v56 = vpop.f32.mrb[17].mxu0 }
 0x5fd   :  { %v2453_v57 = vadd.f32 %v3252_v52, %v2452_v56 }
 0x5fe   :  { %v2492_v58 = vsel %vm797_vm3, %v2458_v5, 0.0 }
 0x5ff   :  { %v2491_v55 = vsel %vm797_vm3, %v2453_v57, 0.0  ;;  %v3657_v6 = vpop.f32.mrb[18].mxu0 }
 0x600   :  { %v2493_v63 = vadd.f32 %v2492_v58, %v2491_v55  ;;  %v2462_v7 = vpop.f32.mrb[19].mxu0  ;;  %v2468_v62 = vadd.f32 %v3657_v6, %v3252_v52 }
 0x601   :  { %v2463_v8 = vadd.f32 %v3252_v52, %v2462_v7 }
 0x602   :  { %v2496_v39 = vsel %vm797_vm3, %v2468_v62, 0.0 }
 0x603   :  { %v2494_v34 = vsel %vm797_vm3, %v2463_v8, 0.0  ;;  %v3660_v10 = vpop.f32.mrb[20].mxu0 }
 0x604   :  { %v2495_v37 = vadd.f32 %v2494_v34, %v2493_v63  ;;  %v2472_v11 = vpop.f32.mrb[21].mxu0  ;;  %v2478_v12 = vadd.f32 %v3660_v10, %v3252_v52 }
 0x605   :  { %v2473_v41 = vadd.f32 %v3252_v52, %v2472_v11 }
 0x606   :  { %v2497_v13 = vadd.f32 %v2496_v39, %v2495_v37  ;;  %v2500_v50 = vsel %vm797_vm3, %v2478_v12, 0.0  ;;  %v2551_v39 = vld [vmem:[%s4777_s15] sm:$0x1] }
 0x607   :  { %v2498_v43 = vsel %vm797_vm3, %v2473_v41, 0.0  ;;  %v3663_v14 = vpop.f32.mrb[22].mxu0 }
 0x608   :  { %v2499_v46 = vadd.f32 %v2498_v43, %v2497_v13  ;;  %v2482_v15 = vpop.f32.mrb[23].mxu0  ;;  %v2488_v42 = vadd.f32 %v3663_v14, %v3252_v52  ;;  %v3261_v43 = vld [vmem:[%s4778_s16] ss:$0 sm:$0xff] }
 0x609   :  { %v2483_v16 = vadd.f32 %v3252_v52, %v2482_v15 }
 0x60a   :  { %v2501_v17 = vadd.f32 %v2500_v50, %v2499_v46  ;;  %v2504_v21 = vsel %vm797_vm3, %v2488_v42, 0.0 }
 0x60b   :  { %v2502_v18 = vsel %vm797_vm3, %v2483_v16, 0.0 }
 0x60c   :  { %v2503_v20 = vadd.f32 %v2502_v18, %v2501_v17 }
 0x60e   :  { %v2505_v24 = vadd.f32 %v2504_v21, %v2503_v20 }
 0x610   :  { %v2506_v0 = vrot.slane %v2505_v24, 4 }
 0x612   :  { %v2507_v45 = vadd.f32 %v2506_v0, %v2505_v24 }
 0x614   :  { %v2508_v1 = vrot.slane %v2507_v45, 2 }
 0x616   :  { %v2509_v2 = vadd.f32 %v2508_v1, %v2507_v45 }
 0x618   :  { %v2510_v59 = vrot.slane %v2509_v2, 1 }
 0x61a   :  { %v2511_v23 = vadd.f32 %v2510_v59, %v2509_v2 }
 0x61c   :  { %v2512_v3 = vmul.f32 0.015625, %v2511_v23 }
 0x61e   :  { %v2513_v31 = vsub.f32 %v2453_v57, %v2512_v3  ;;  %v2514_v25 = vsub.f32 %v2458_v5, %v2512_v3  ;;  %v2515_v26 = vsub.f32 %v2463_v8, %v2512_v3  ;;  %v2516_v27 = vsub.f32 %v2468_v62, %v2512_v3 }
 0x61f   :  { %v2517_v22 = vsub.f32 %v2473_v41, %v2512_v3  ;;  %v2518_v28 = vsub.f32 %v2478_v12, %v2512_v3  ;;  %v2519_v29 = vsub.f32 %v2483_v16, %v2512_v3  ;;  %v2520_v60 = vsub.f32 %v2488_v42, %v2512_v3 }
 0x620   :  { %v2521_v61 = vmul.f32 %v2513_v31, %v2513_v31  ;;  %v2522_v4 = vmul.f32 %v2514_v25, %v2514_v25  ;;  %v2523_v32 = vmul.f32 %v2515_v26, %v2515_v26  ;;  %v2524_v33 = vmul.f32 %v2516_v27, %v2516_v27 }
 0x621   :  { %v2525_v40 = vmul.f32 %v2517_v22, %v2517_v22  ;;  %v2526_v48 = vmul.f32 %v2518_v28, %v2518_v28  ;;  %v2527_v52 = vmul.f32 %v2519_v29, %v2519_v29  ;;  %v2528_v54 = vmul.f32 %v2520_v60, %v2520_v60 }
 0x622   :  { %v2529_v35 = vsel %vm797_vm3, %v2521_v61, 0.0  ;;  %v2530_v36 = vsel %vm797_vm3, %v2522_v4, 0.0  ;;  %v2532_v30 = vsel %vm797_vm3, %v2523_v32, 0.0  ;;  %v2534_v9 = vsel %vm797_vm3, %v2524_v33, 0.0 }
 0x623   :  { %v2531_v38 = vadd.f32 %v2530_v36, %v2529_v35  ;;  %v2536_v53 = vsel %vm797_vm3, %v2525_v40, 0.0  ;;  %v2538_v5 = vsel %vm797_vm3, %v2526_v48, 0.0  ;;  %v2540_v57 = vsel %vm797_vm3, %v2527_v52, 0.0 }
 0x624   :  { %v2542_v55 = vsel %vm797_vm3, %v2528_v54, 0.0 }
 0x625   :  { %v2533_v44 = vadd.f32 %v2532_v30, %v2531_v38 }
 0x627   :  { %v2535_v51 = vadd.f32 %v2534_v9, %v2533_v44 }
 0x629   :  { %v2537_v49 = vadd.f32 %v2536_v53, %v2535_v51 }
 0x62b   :  { %v2539_v56 = vadd.f32 %v2538_v5, %v2537_v49 }
 0x62d   :  { %v2541_v58 = vadd.f32 %v2540_v57, %v2539_v56 }
 0x62f   :  { %v2543_v6 = vadd.f32 %v2542_v55, %v2541_v58 }
 0x631   :  { %v2544_v63 = vrot.slane %v2543_v6, 4 }
 0x633   :  { %v2545_v7 = vadd.f32 %v2544_v63, %v2543_v6 }
 0x635   :  { %v2546_v62 = vrot.slane %v2545_v7, 2 }
 0x637   :  { %v2547_v8 = vadd.f32 %v2546_v62, %v2545_v7 }
 0x639   :  { %v2548_v34 = vrot.slane %v2547_v8, 1 }
 0x63b   :  { %v2549_v10 = vadd.f32 %v2548_v34, %v2547_v8 }
 0x63d   :  { %v2550_v37 = vmul.f32 0.015625, %v2549_v10 }
 0x63f   :  { %v2552_v11 = vadd.f32 1e-05, %v2550_v37 }
 0x641   :  { %3908 = vrsqrt.f32 %v2552_v11  ;;  %v3280_v11 = vld [vmem:[%s4779_s17 + $0x20] sm:$0xff] }
 0x64b   :  { %v3909_v12 = vpop.eup %3908 }
 0x64c   :  { %v2554_v41 = vmul.f32 %v3909_v12, %v2551_v39  ;;  %v3281_v39 = vld [vmem:[%s4779_s17 + $0x28] sm:$0xff] }
 0x64e   :  { %v2559_v13 = vrot.slane %v2554_v41, %v4385_v19  ;;  %v3726_v41 = vpack.c.bf16 %v3281_v39, %v3280_v11 }
 0x650   :  { %v2561_v14 = vmul.f32 %v2559_v13, %v2513_v31  ;;  %v2562_v46 = vmul.f32 %v2559_v13, %v2514_v25  ;;  %v2563_v15 = vmul.f32 %v2559_v13, %v2515_v26  ;;  %v2564_v50 = vmul.f32 %v2559_v13, %v2516_v27 }
 0x651   :  { %v2565_v42 = vmul.f32 %v2559_v13, %v2517_v22  ;;  %v2566_v16 = vmul.f32 %v2559_v13, %v2518_v28  ;;  %v2567_v17 = vmul.f32 %v2559_v13, %v2519_v29  ;;  %v2568_v18 = vmul.f32 %v2559_v13, %v2520_v60 }
 0x652   :  { %v2576_v20 = vadd.f32 %v3261_v43, %v2561_v14  ;;  %v2577_v21 = vadd.f32 %v3261_v43, %v2562_v46  ;;  %v2578_v24 = vadd.f32 %v3261_v43, %v2563_v15  ;;  %v2579_v0 = vadd.f32 %v3261_v43, %v2564_v50 }
 0x653   :  { %v2580_v45 = vadd.f32 %v3261_v43, %v2565_v42  ;;  %v2581_v1 = vadd.f32 %v3261_v43, %v2566_v16  ;;  %v2582_v2 = vadd.f32 %v3261_v43, %v2567_v17  ;;  %v2583_v61 = vadd.f32 %v3261_v43, %v2568_v18 }
 0x654   :  { %v3262_v59 = vmul.f32 -1.442695, %v2576_v20  ;;  %v3263_v23 = vmul.f32 -1.442695, %v2577_v21  ;;  %v3264_v3 = vmul.f32 -1.442695, %v2578_v24 }
 0x655   :  { %v3265_v4 = vmul.f32 -1.442695, %v2579_v0  ;;  %v3266_v31 = vmul.f32 -1.442695, %v2580_v45  ;;  %v3267_v25 = vmul.f32 -1.442695, %v2581_v1 }
 0x656   :  { %3910 = vpow2.f32 %v3262_v59  ;;  %v3268_v26 = vmul.f32 -1.442695, %v2582_v2  ;;  %v3269_v27 = vmul.f32 -1.442695, %v2583_v61 }
 0x657   :  { %3912 = vpow2.f32 %v3263_v23 }
 0x658   :  { %3914 = vpow2.f32 %v3264_v3 }
 0x659   :  { %3916 = vpow2.f32 %v3265_v4 }
 0x65a   :  { %3918 = vpow2.f32 %v3266_v31 }
 0x65b   :  { %3920 = vpow2.f32 %v3267_v25 }
 0x65c   :  { %3922 = vpow2.f32 %v3268_v26 }
 0x65d   :  { %3924 = vpow2.f32 %v3269_v27 }
 0x660   :  { %v3911_v22 = vpop.eup %3910 }
 0x661   :  { %v3913_v28 = vpop.eup %3912  ;;  %v2608_v29 = vadd.f32 1.0, %v3911_v22 }
 0x662   :  { %v3915_v60 = vpop.eup %3914  ;;  %v2609_v32 = vadd.f32 1.0, %v3913_v28 }
 0x663   :  { %v3917_v33 = vpop.eup %3916  ;;  %v2610_v35 = vadd.f32 1.0, %v3915_v60  ;;  %3926 = vrcp.f32 %v2608_v29 }
 0x664   :  { %v3919_v36 = vpop.eup %3918  ;;  %v2611_v38 = vadd.f32 1.0, %v3917_v33  ;;  %3928 = vrcp.f32 %v2609_v32 }
 0x665   :  { %v3921_v40 = vpop.eup %3920  ;;  %v2612_v30 = vadd.f32 1.0, %v3919_v36  ;;  %3930 = vrcp.f32 %v2610_v35 }
 0x666   :  { %v3923_v44 = vpop.eup %3922  ;;  %v2613_v48 = vadd.f32 1.0, %v3921_v40  ;;  %3932 = vrcp.f32 %v2611_v38 }
 0x667   :  { %v3925_v9 = vpop.eup %3924  ;;  %v2614_v51 = vadd.f32 1.0, %v3923_v44  ;;  %3934 = vrcp.f32 %v2612_v30 }
 0x668   :  { %v2615_v52 = vadd.f32 1.0, %v3925_v9  ;;  %3936 = vrcp.f32 %v2613_v48 }
 0x669   :  { %3938 = vrcp.f32 %v2614_v51 }
 0x66a   :  { %3940 = vrcp.f32 %v2615_v52 }
 0x66d   :  { %v3927_v53 = vpop.eup %3926 }
 0x66e   :  { %v3929_v49 = vpop.eup %3928  ;;  %v2632_v54 = vmul.f32 %v3927_v53, %v2576_v20  ;;  %v3286_v20 = vld [vmem:[%s4780_s18] ss:$0 sm:$0xff] }
 0x66f   :  { %v3931_v5 = vpop.eup %3930  ;;  %v2633_v56 = vmul.f32 %v3929_v49, %v2577_v21 }
 0x670   :  { %v3933_v57 = vpop.eup %3932  ;;  %v2634_v58 = vmul.f32 %v3931_v5, %v2578_v24  ;;  %2644 = vst.msk [vmem:[#allocation5 + $0x1] sm:$0xff] %vm797_vm3, %v2632_v54 }
 0x671   :  { %v3935_v55 = vpop.eup %3934  ;;  %v2635_v6 = vmul.f32 %v3933_v57, %v2579_v0  ;;  %2645 = vst.msk [vmem:[#allocation5 + $0x9] sm:$0xff] %vm797_vm3, %v2633_v56 }
 0x672   :  { %v3937_v63 = vpop.eup %3936  ;;  %v2636_v7 = vmul.f32 %v3935_v55, %v2580_v45  ;;  %2646 = vst.msk [vmem:[#allocation5 + $0x11] sm:$0xff] %vm797_vm3, %v2634_v58 }
 0x673   :  { %v3939_v62 = vpop.eup %3938  ;;  %v2637_v8 = vmul.f32 %v3937_v63, %v2581_v1  ;;  %2647 = vst.msk [vmem:[#allocation5 + $0x19] sm:$0xff] %vm797_vm3, %v2635_v6 }
 0x674   :  { %v3941_v34 = vpop.eup %3940  ;;  %v2638_v10 = vmul.f32 %v3939_v62, %v2582_v2  ;;  %2648 = vst.msk [vmem:[#allocation5 + $0x29] sm:$0xff] %vm797_vm3, %v2636_v7 }
 0x675   :  { %v2639_v37 = vmul.f32 %v3941_v34, %v2583_v61  ;;  %2649 = vst.msk [vmem:[#allocation5 + $0x31] sm:$0xff] %vm797_vm3, %v2637_v8 }
 0x676   :  { %2650 = vst.msk [vmem:[#allocation5 + $0x39] sm:$0xff] %vm797_vm3, %v2638_v10  ;;  %v3026_v10 = vld [vmem:[%s4781_s19] sm:$0x1]  ;;  %s3985_s19 = smov [#allocation6]  }
 0x677   :  { %2651 = vst.msk [vmem:[#allocation5 + $0x41] sm:$0xff] %vm797_vm3, %v2639_v37 }
 0x678   :  { %v2662_v12 = vld [vmem:[#allocation5 + $0x1] ss:$2 sm:$0xff]  ;;  %v2652_v46 = vld [vmem:[#allocation5] ss:$2 sm:$0xff] }
 0x679   :  { %3668 = vmatprep.mubr.msk.f32.mxu0 %vm797_vm3, %v2662_v12  ;;  %v3287_v12 = vld [vmem:[%s4782_s20] ss:$0 sm:$0xff]  ;;  %s3088_s20 = sshll.u32 %s3985_s19, 4  ;;  %s3089_s20 = int_to_ptr.vmem [resolvable:$true] %s3088_s20 }
 0x67a   :  { %v2664_v13 = vld [vmem:[#allocation5 + $0x11] ss:$2 sm:$0xff]  ;;  %v2654_v15 = vld [vmem:[#allocation5 + $0x10] ss:$2 sm:$0xff]  ;;  %s3960_s0 = scalar_lea.vmem %s3089_s20, 512  ;;  %p3965_p1 = scmp.lt.s32.totalorder %s3089_s20, %s3089_s20 }
 0x67b   :  { %3669 = vmatmul.mubr.msk.f32.vlgmr.msra.gmra.mrb[24].mxu0 %vm797_vm3, %v2664_v13  ;;  %v2869_v16 = vld [vmem:[#allocation5 + $0x12] ss:$2 sm:$0xff]  ;;  %p3961_p0 = scmp.ne.s32.totalorder %s3089_s20, %s3960_s0  ;;  %p3966_p2 = scmp.lt.s32.totalorder %s3960_s0, %s3960_s0 }
 0x67c   :  { %3725 = vmatpush3.bf16.msra.mxu0 %v4675_v47  ;;  %v2666_v43 = vld [vmem:[#allocation5 + $0x29] ss:$2 sm:$0xff]  ;;  %v2656_v50 = vld [vmem:[#allocation5 + $0x28] ss:$2 sm:$0xff] }
 0x67d   :  { %3671 = vmatprep.mubr.msk.f32.mxu0 %vm797_vm3, %v2666_v43  ;;  %3727 = vmatprep.subr.bf16.mxu0 %v3726_v41  ;;  %v2867_v47 = vld [vmem:[#allocation5 + $0x2] ss:$2 sm:$0xff]  ;;  %p3967_p3 = por %p3966_p2, %p3965_p1 }
 0x67e   :  { %v2668_v14 = vld [vmem:[#allocation5 + $0x39] ss:$2 sm:$0xff]  ;;  %v2658_v42 = vld [vmem:[#allocation5 + $0x38] ss:$2 sm:$0xff] }
 0x67f   :  { %3672 = vmatmul.mubr.msk.f32.gmra.mrb[26].mxu0 %vm797_vm3, %v2668_v14  ;;  %v2871_v17 = vld [vmem:[#allocation5 + $0x2a] ss:$2 sm:$0xff]  ;;  %v2873_v18 = vld [vmem:[#allocation5 + $0x3a] ss:$2 sm:$0xff]  ;;  %p3968_p4 = pnand %p3967_p3, %p3961_p0 }
 0x680   :  { %3678 = vmatprep.mubr.msk.f32.mxu0 %vm797_vm3, %v2652_v46 }
 0x683   :  { %3679 = vmatmul.mubr.msk.f32.vlgmr.msra.gmra.mrb[24].mxu0 %vm797_vm3, %v2654_v15 }
 0x684   :  { %3729 = vmatpush3.bf16.msra.mxu0 %v3726_v41  ;;  %3681 = vmatprep.mubr.msk.f32.mxu0 %vm797_vm3, %v2656_v50 }
 0x687   :  { %3682 = vmatmul.mubr.msk.f32.gmra.mrb[26].mxu0 %vm797_vm3, %v2658_v42 }
 0x688   :  { %3688 = vmatprep.mubr.msk.f32.mxu0 %vm797_vm3, %v2867_v47 }
 0x68b   :  { %3689 = vmatmul.mubr.msk.f32.vlgmr.msra.gmra.mrb[24].mxu0 %vm797_vm3, %v2869_v16 }
 0x68c   :  { %3691 = vmatprep.mubr.msk.f32.mxu0 %vm797_vm3, %v2871_v17 }
 0x68f   :  { %3692 = vmatmul.mubr.msk.f32.gmra.mrb[26].mxu0 %vm797_vm3, %v2873_v18 }
 0x75e   :  { %v3690_v21 = vpop.f32.mrb[24].mxu0 }
 0x75f   :  { %v2986_v24 = vadd.f32 %v3690_v21, %v3286_v20  ;;  %v2955_v0 = vpop.f32.mrb[25].mxu0 }
 0x760   :  { %v2985_v45 = vadd.f32 %v3286_v20, %v2955_v0 }
 0x761   :  { %v2990_v1 = vsel %vm2361_vm7, %v2986_v24, 0.0 }
 0x762   :  { %v2989_v2 = vsel %vm2361_vm7, %v2985_v45, 0.0  ;;  %v3693_v59 = vpop.f32.mrb[26].mxu0 }
 0x763   :  { %v2991_v23 = vadd.f32 %v2990_v1, %v2989_v2  ;;  %v2965_v3 = vpop.f32.mrb[27].mxu0  ;;  %v2988_v61 = vadd.f32 %v3693_v59, %v3286_v20 }
 0x764   :  { %v2987_v4 = vadd.f32 %v3286_v20, %v2965_v3 }
 0x765   :  { %v2994_v26 = vsel %vm2361_vm7, %v2988_v61, 0.0 }
 0x766   :  { %v2992_v31 = vsel %vm2361_vm7, %v2987_v4, 0.0 }
 0x767   :  { %v2993_v25 = vadd.f32 %v2992_v31, %v2991_v23 }
 0x769   :  { %v2995_v27 = vadd.f32 %v2994_v26, %v2993_v25 }
 0x76b   :  { %v2996_v22 = vrot.slane %v2995_v27, 4 }
 0x76d   :  { %v2997_v28 = vadd.f32 %v2996_v22, %v2995_v27 }
 0x76f   :  { %v2998_v29 = vrot.slane %v2997_v28, 2 }
 0x771   :  { %v2999_v60 = vadd.f32 %v2998_v29, %v2997_v28 }
 0x773   :  { %v3000_v32 = vrot.slane %v2999_v60, 1 }
 0x775   :  { %v3001_v33 = vadd.f32 %v3000_v32, %v2999_v60 }
 0x777   :  { %v3003_v35 = vmul.f32 0.03125, %v3001_v33 }
 0x779   :  { %v3004_v36 = vsub.f32 %v2985_v45, %v3003_v35  ;;  %v3005_v38 = vsub.f32 %v2986_v24, %v3003_v35  ;;  %v3006_v40 = vsub.f32 %v2987_v4, %v3003_v35  ;;  %v3007_v30 = vsub.f32 %v2988_v61, %v3003_v35 }
 0x77b   :  { %v3008_v44 = vmul.f32 %v3004_v36, %v3004_v36  ;;  %v3009_v48 = vmul.f32 %v3005_v38, %v3005_v38  ;;  %v3010_v9 = vmul.f32 %v3006_v40, %v3006_v40  ;;  %v3011_v51 = vmul.f32 %v3007_v30, %v3007_v30 }
 0x77d   :  { %v3012_v52 = vsel %vm2361_vm7, %v3008_v44, 0.0  ;;  %v3013_v53 = vsel %vm2361_vm7, %v3009_v48, 0.0  ;;  %v3015_v54 = vsel %vm2361_vm7, %v3010_v9, 0.0  ;;  %v3017_v56 = vsel %vm2361_vm7, %v3011_v51, 0.0 }
 0x77e   :  { %v3014_v49 = vadd.f32 %v3013_v53, %v3012_v52 }
 0x780   :  { %v3016_v5 = vadd.f32 %v3015_v54, %v3014_v49 }
 0x782   :  { %v3018_v57 = vadd.f32 %v3017_v56, %v3016_v5 }
 0x784   :  { %v3019_v58 = vrot.slane %v3018_v57, 4 }
 0x786   :  { %v3020_v55 = vadd.f32 %v3019_v58, %v3018_v57 }
 0x788   :  { %v3021_v6 = vrot.slane %v3020_v55, 2 }
 0x78a   :  { %v3022_v63 = vadd.f32 %v3021_v6, %v3020_v55 }
 0x78c   :  { %v3023_v7 = vrot.slane %v3022_v63, 1 }
 0x78e   :  { %v3024_v62 = vadd.f32 %v3023_v7, %v3022_v63 }
 0x790   :  { %v3025_v8 = vmul.f32 0.03125, %v3024_v62 }
 0x792   :  { %v3027_v34 = vadd.f32 1e-05, %v3025_v8 }
 0x794   :  { %3942 = vrsqrt.f32 %v3027_v34 }
 0x79e   :  { %v3943_v37 = vpop.eup %3942 }
 0x79f   :  { %v3029_v11 = vmul.f32 %v3943_v37, %v3026_v10 }
 0x7a1   :  { %v3034_v39 = vrot.slane %v3029_v11, %v4385_v19 }
 0x7a3   :  { %v3036_v41 = vmul.f32 %v3034_v39, %v3004_v36  ;;  %v3037_v13 = vmul.f32 %v3034_v39, %v3005_v38  ;;  %v3038_v43 = vmul.f32 %v3034_v39, %v3006_v40  ;;  %v3039_v14 = vmul.f32 %v3034_v39, %v3007_v30 }
 0x7a5   :  { %v3047_v46 = vadd.f32 %v3287_v12, %v3036_v41  ;;  %v3048_v15 = vadd.f32 %v3287_v12, %v3037_v13  ;;  %v3049_v50 = vadd.f32 %v3287_v12, %v3038_v43  ;;  %v3050_v42 = vadd.f32 %v3287_v12, %v3039_v14 }
 0x7a7   :  { %v3288_v47 = vmul.f32 -1.442695, %v3047_v46  ;;  %v3289_v16 = vmul.f32 -1.442695, %v3048_v15  ;;  %v3290_v17 = vmul.f32 -1.442695, %v3049_v50 }
 0x7a8   :  { %v3291_v18 = vmul.f32 -1.442695, %v3050_v42 }
 0x7a9   :  { %3944 = vpow2.f32 %v3288_v47 }
 0x7aa   :  { %3946 = vpow2.f32 %v3289_v16 }
 0x7ab   :  { %3948 = vpow2.f32 %v3290_v17 }
 0x7ac   :  { %3950 = vpow2.f32 %v3291_v18 }
 0x7b3   :  { %v3945_v19 = vpop.eup %3944 }
 0x7b4   :  { %v3947_v20 = vpop.eup %3946  ;;  %v3063_v21 = vadd.f32 1.0, %v3945_v19 }
 0x7b5   :  { %v3949_v24 = vpop.eup %3948  ;;  %v3064_v0 = vadd.f32 1.0, %v3947_v20 }
 0x7b6   :  { %v3951_v45 = vpop.eup %3950  ;;  %v3065_v1 = vadd.f32 1.0, %v3949_v24  ;;  %3952 = vrcp.f32 %v3063_v21 }
 0x7b7   :  { %v3066_v2 = vadd.f32 1.0, %v3951_v45  ;;  %3954 = vrcp.f32 %v3064_v0 }
 0x7b8   :  { %3956 = vrcp.f32 %v3065_v1 }
 0x7b9   :  { %3958 = vrcp.f32 %v3066_v2 }
 0x7c0   :  { %v3953_v59 = vpop.eup %3952 }
 0x7c1   :  { %v3955_v23 = vpop.eup %3954  ;;  %v3075_v3 = vmul.f32 %v3953_v59, %v3047_v46 }
 0x7c2   :  { %v3957_v61 = vpop.eup %3956  ;;  %v3076_v4 = vmul.f32 %v3955_v23, %v3048_v15 }
 0x7c3   :  { %v3959_v31 = vpop.eup %3958  ;;  %v3077_v25 = vmul.f32 %v3957_v61, %v3049_v50  ;;  %3079 = vst.msk [vmem:[#allocation6] sm:$0xff] %vm2361_vm7, %v3075_v3 }
 0x7c4   :  { %v3078_v26 = vmul.f32 %v3959_v31, %v3050_v42  ;;  %3080 = vst.msk [vmem:[#allocation6 + $0x8] sm:$0xff] %vm2361_vm7, %v3076_v4 }
 0x7c5   :  { %3081 = vst.msk [vmem:[#allocation6 + $0x10] sm:$0xff] %vm2361_vm7, %v3077_v25 }
 0x7c6   :  { %3082 = vst.msk [vmem:[#allocation6 + $0x18] sm:$0xff] %vm2361_vm7, %v3078_v26 }
 0x7c7   :  { %3971 = shalt.err (!%p3968_p4)
}
 0x7c8   :  { %s3972_s30 = scalar_lea.hbm %s4783_s21, 512 }
 0x7c9   :  { %p3973_p5 = scmp.ne.s32.totalorder %s4783_s21, %s3972_s30  ;;  %p3976_p6 = scmp.lt.u32.totalorder %s3972_s30, %s4783_s21 }
 0x7cb   :  { %p3978_p7 = pnand %p3976_p6, %p3973_p5 }
 0x7cd   :  { %3981 = shalt.err (!%p3978_p7)
}
 0x7ce   :  { %s3986_s1 = smov 128   ;;  %s3987_s8 = smov 8  }
 0x7cf   :  { %3094 = dma.vmem_to_hbm [thread:$0]  %s3089_s20, 512, %s4783_s21, [#allocation7], %s3986_s1, %s3986_s1, %s3987_s8  }
 0x7d0   :  { %3982 = dma.done.wait [#allocation7], 512  }
 0x7d1   :  { %3983 = vsyncadd [#allocation7], 4294966784 }
 0x7d2   :  { %3098 = vsyncpa [#allocation7], 1 }

</bundles_post_ra>
